<compile_context>
chip_gen: v7x
topology: tpu7x:2x2x1
jax: 0.10.0
libtpu: 0.0.40
codegen_flags: <defaults>
</compile_context>

<pallas_src>
import jax
import jax.numpy as jnp
from jax.experimental import pallas as pl
from jax.experimental.pallas import tpu as pltpu

K_IN = 28 * 28     # 784 (multiple of 8; Mosaic pads the lane dim internally)
HID = 512
OUT = 10
OUT_PAD = 128      # lane-dense final layer


def mlp_kernel(x_ref, w1_ref, b1_ref, w2_ref, b2_ref, w3_ref, b3_ref, o_ref):
    # x_ref: (tb, 784) f32; weights bf16; biases f32; o_ref: (tb, 128) bf16.
    x = x_ref[...].astype(jnp.bfloat16)                       # in-kernel cast (VPU, hides under MXU)
    h1 = jnp.dot(x, w1_ref[...], preferred_element_type=jnp.float32) + b1_ref[...]
    h1 = jnp.maximum(h1, 0.0).astype(jnp.bfloat16)            # ReLU, bf16 feed to next MXU pass
    h2 = jnp.dot(h1, w2_ref[...], preferred_element_type=jnp.float32) + b2_ref[...]
    h2 = jnp.maximum(h2, 0.0).astype(jnp.bfloat16)
    logits = jnp.dot(h2, w3_ref[...], preferred_element_type=jnp.float32) + b3_ref[...]
    o_ref[...] = logits.astype(o_ref.dtype)                   # (tb, 128) bf16, unmasked lane-dense stores


def _default_tile(batch):
    """Batch tile: multiple of 256 (v6e/v7x MXU rows), capped at 512, >= 2 grid
    tiles whenever the batch allows it (v7x megacore). Tiny batches use a single
    full-batch tile (block shape == full array dims is always a legal BlockSpec)."""
    if batch <= 256:
        return batch
    half = pl.cdiv(batch, 2)
    tb = min(512, pl.cdiv(half, 256) * 256)
    return min(tb, batch)


def simple_nn_forward(x_nchw, params, *, tb=None):
    """x_nchw: (B, 1, 28, 28) float32 (NCHW, like PyTorch). Returns (B, 10) f32 logits."""
    w1, b1, w2, b2, w3, b3 = params
    B = x_nchw.shape[0]
    tb = _default_tile(B) if tb is None else min(tb, B)
    n_tiles = pl.cdiv(B, tb)

    # nn.Flatten(): row-major over (C, H, W) -- a free reshape, no copy / pad / cast.
    x_flat = x_nchw.reshape(B, K_IN)

    weight_bytes = (w1.size + w2.size + w3.size) * 2 + (b1.size + b2.size + b3.size) * 4
    cost = pl.CostEstimate(
        flops=2 * B * (K_IN * HID + HID * HID + HID * OUT_PAD),
        transcendentals=0,
        bytes_accessed=weight_bytes + x_flat.size * 4 + B * OUT_PAD * 2,
    )

    out = pl.pallas_call(
        mlp_kernel,
        out_shape=jax.ShapeDtypeStruct((B, OUT_PAD), jnp.bfloat16),
        grid=(n_tiles,),
        in_specs=[
            pl.BlockSpec((tb, K_IN), lambda i: (i, 0)),         # x: tiled over batch, f32
            pl.BlockSpec((K_IN, HID), lambda i: (0, 0)),        # w1: VMEM-resident
            pl.BlockSpec((1, HID), lambda i: (0, 0)),           # b1: resident
            pl.BlockSpec((HID, HID), lambda i: (0, 0)),         # w2: resident
            pl.BlockSpec((1, HID), lambda i: (0, 0)),           # b2: resident
            pl.BlockSpec((HID, OUT_PAD), lambda i: (0, 0)),     # w3 (lane-padded): resident
            pl.BlockSpec((1, OUT_PAD), lambda i: (0, 0)),       # b3 (lane-padded): resident
        ],
        out_specs=pl.BlockSpec((tb, OUT_PAD), lambda i: (i, 0)),
        compiler_params=pltpu.CompilerParams(
            dimension_semantics=("parallel",),
            vmem_limit_bytes=32 << 20,
        ),
        cost_estimate=cost,
    )(x_flat, w1, b1, w2, b2, w3, b3)

    return out[:, :OUT].astype(jnp.float32)


def init_params(key):
    """Deterministic synthetic params matching PyTorch Linear shapes (out, in),
    transposed to (in, out); bf16 weights, f32 biases; layer-3 lane-padded to 128."""
    k1, k2, k3, k4, k5, k6 = jax.random.split(key, 6)
    w1_pt = jax.random.normal(k1, (HID, K_IN), jnp.float32) * (1.0 / jnp.sqrt(float(K_IN)))
    b1_pt = jax.random.normal(k2, (HID,), jnp.float32) * 0.01
    w2_pt = jax.random.normal(k3, (HID, HID), jnp.float32) * (1.0 / jnp.sqrt(float(HID)))
    b2_pt = jax.random.normal(k4, (HID,), jnp.float32) * 0.01
    w3_pt = jax.random.normal(k5, (OUT, HID), jnp.float32) * (1.0 / jnp.sqrt(float(HID)))
    b3_pt = jax.random.normal(k6, (OUT,), jnp.float32) * 0.01

    w1 = w1_pt.T.astype(jnp.bfloat16)                                           # (784, 512)
    w2 = w2_pt.T.astype(jnp.bfloat16)                                           # (512, 512)
    w3 = jnp.pad(w3_pt.T, ((0, 0), (0, OUT_PAD - OUT))).astype(jnp.bfloat16)    # (512, 128)
    b1 = b1_pt.reshape(1, HID)                                                  # f32
    b2 = b2_pt.reshape(1, HID)                                                  # f32
    b3 = jnp.pad(b3_pt, (0, OUT_PAD - OUT)).reshape(1, OUT_PAD)                 # f32, zero-padded
    return (w1, b1, w2, b2, w3, b3)


def reference_forward(x_nchw, params):
    """Pure-JAX reference mirroring the kernel's bf16 compute / f32 accumulate path."""
    w1, b1, w2, b2, w3, b3 = params
    B = x_nchw.shape[0]
    x = x_nchw.reshape(B, K_IN).astype(jnp.bfloat16)
    h1 = jnp.maximum(jnp.dot(x, w1, preferred_element_type=jnp.float32) + b1, 0.0)
    h1 = h1.astype(jnp.bfloat16)
    h2 = jnp.maximum(jnp.dot(h1, w2, preferred_element_type=jnp.float32) + b2, 0.0)
    h2 = h2.astype(jnp.bfloat16)
    logits = jnp.dot(h2, w3, preferred_element_type=jnp.float32) + b3
    logits = logits.astype(jnp.bfloat16).astype(jnp.float32)   # mirror the kernel's bf16 output store
    return logits[:, :OUT]


if __name__ == "__main__":
    key = jax.random.PRNGKey(0)
    kx, kp = jax.random.split(key)
    # Small batch; spatial shape fixed by the module (1x28x28).
    x = jax.random.normal(kx, (2, 1, 28, 28), jnp.float32)
    params = init_params(kp)

    logits = simple_nn_forward(x, params)
    logits = jax.block_until_ready(logits)

    ref = reference_forward(x, params)
    assert logits.shape == (2, OUT)
    assert jnp.allclose(logits, ref, atol=1e-2, rtol=1e-2), (
        f"max abs err {jnp.max(jnp.abs(logits - ref))}")
    print("KERNEL_OK")
</pallas_src>

<mosaic_0001>
module attributes {stable_mosaic.version = 11 : i64} {
  func.func @mlp_kernel(%arg0: i32, %arg1: memref<2x784xf32, #tpu.memory_space<vmem>>, %arg2: memref<784x512xbf16, #tpu.memory_space<vmem>>, %arg3: memref<1x512xf32, #tpu.memory_space<vmem>>, %arg4: memref<512x512xbf16, #tpu.memory_space<vmem>>, %arg5: memref<1x512xf32, #tpu.memory_space<vmem>>, %arg6: memref<512x128xbf16, #tpu.memory_space<vmem>>, %arg7: memref<1x128xf32, #tpu.memory_space<vmem>>, %arg8: memref<2x128xbf16, #tpu.memory_space<vmem>>) attributes {dimension_semantics = [#tpu.dimension_semantics<parallel>], iteration_bounds = array<i64: 1>, scalar_prefetch = 0 : i64, scratch_operands = 0 : i64, tpu.core_type = #tpu.core_type<tc>, window_params = [{transform_indices = @transform_0, window_bounds = array<i64: 2, 784>}, {pipeline_mode = #tpu.pipeline_mode<synchronous>, transform_indices = @transform_1, window_bounds = array<i64: 784, 512>}, {pipeline_mode = #tpu.pipeline_mode<synchronous>, transform_indices = @transform_2, window_bounds = array<i64: 1, 512>}, {pipeline_mode = #tpu.pipeline_mode<synchronous>, transform_indices = @transform_3, window_bounds = array<i64: 512, 512>}, {pipeline_mode = #tpu.pipeline_mode<synchronous>, transform_indices = @transform_4, window_bounds = array<i64: 1, 512>}, {pipeline_mode = #tpu.pipeline_mode<synchronous>, transform_indices = @transform_5, window_bounds = array<i64: 512, 128>}, {pipeline_mode = #tpu.pipeline_mode<synchronous>, transform_indices = @transform_6, window_bounds = array<i64: 1, 128>}, {transform_indices = @transform_7, window_bounds = array<i64: 2, 128>}]} {
    %c0 = arith.constant 0 : index
    %c0_0 = arith.constant 0 : index
    %0 = vector.load %arg1[%c0, %c0_0] : memref<2x784xf32, #tpu.memory_space<vmem>>, vector<2x784xf32>
    %1 = arith.truncf %0 : vector<2x784xf32> to vector<2x784xbf16>
    %c0_1 = arith.constant 0 : index
    %c0_2 = arith.constant 0 : index
    %2 = vector.load %arg2[%c0_1, %c0_2] : memref<784x512xbf16, #tpu.memory_space<vmem>>, vector<784x512xbf16>
    %cst = arith.constant dense<0.000000e+00> : vector<2x512xf32>
    %3 = tpu.matmul %1, %2, %cst {dimension_numbers = #tpu.dot_dimension_numbers<[1], [0], [0], [1], [0, 0, 1, 1], [], []>} : vector<2x784xbf16>, vector<784x512xbf16>, vector<2x512xf32> -> vector<2x512xf32>
    %c0_3 = arith.constant 0 : index
    %c0_4 = arith.constant 0 : index
    %4 = vector.load %arg3[%c0_3, %c0_4] : memref<1x512xf32, #tpu.memory_space<vmem>>, vector<1x512xf32>
    %5 = vector.broadcast %4 : vector<1x512xf32> to vector<2x512xf32>
    %6 = arith.addf %3, %5 : vector<2x512xf32>
    %cst_5 = arith.constant 0.000000e+00 : f32
    %7 = vector.broadcast %cst_5 : f32 to vector<2x512xf32>
    %8 = arith.maximumf %6, %7 : vector<2x512xf32>
    %9 = arith.truncf %8 : vector<2x512xf32> to vector<2x512xbf16>
    %c0_6 = arith.constant 0 : index
    %c0_7 = arith.constant 0 : index
    %10 = vector.load %arg4[%c0_6, %c0_7] : memref<512x512xbf16, #tpu.memory_space<vmem>>, vector<512x512xbf16>
    %cst_8 = arith.constant dense<0.000000e+00> : vector<2x512xf32>
    %11 = tpu.matmul %9, %10, %cst_8 {dimension_numbers = #tpu.dot_dimension_numbers<[1], [0], [0], [1], [0, 0, 1, 1], [], []>} : vector<2x512xbf16>, vector<512x512xbf16>, vector<2x512xf32> -> vector<2x512xf32>
    %c0_9 = arith.constant 0 : index
    %c0_10 = arith.constant 0 : index
    %12 = vector.load %arg5[%c0_9, %c0_10] : memref<1x512xf32, #tpu.memory_space<vmem>>, vector<1x512xf32>
    %13 = vector.broadcast %12 : vector<1x512xf32> to vector<2x512xf32>
    %14 = arith.addf %11, %13 : vector<2x512xf32>
    %cst_11 = arith.constant 0.000000e+00 : f32
    %15 = vector.broadcast %cst_11 : f32 to vector<2x512xf32>
    %16 = arith.maximumf %14, %15 : vector<2x512xf32>
    %17 = arith.truncf %16 : vector<2x512xf32> to vector<2x512xbf16>
    %c0_12 = arith.constant 0 : index
    %c0_13 = arith.constant 0 : index
    %18 = vector.load %arg6[%c0_12, %c0_13] : memref<512x128xbf16, #tpu.memory_space<vmem>>, vector<512x128xbf16>
    %cst_14 = arith.constant dense<0.000000e+00> : vector<2x128xf32>
    %19 = tpu.matmul %17, %18, %cst_14 {dimension_numbers = #tpu.dot_dimension_numbers<[1], [0], [0], [1], [0, 0, 1, 1], [], []>} : vector<2x512xbf16>, vector<512x128xbf16>, vector<2x128xf32> -> vector<2x128xf32>
    %c0_15 = arith.constant 0 : index
    %c0_16 = arith.constant 0 : index
    %20 = vector.load %arg7[%c0_15, %c0_16] : memref<1x128xf32, #tpu.memory_space<vmem>>, vector<1x128xf32>
    %21 = vector.broadcast %20 : vector<1x128xf32> to vector<2x128xf32>
    %22 = arith.addf %19, %21 : vector<2x128xf32>
    %23 = arith.truncf %22 : vector<2x128xf32> to vector<2x128xbf16>
    %c0_17 = arith.constant 0 : index
    %c0_18 = arith.constant 0 : index
    %24 = vector.load %arg8[%c0_17, %c0_18] : memref<2x128xbf16, #tpu.memory_space<vmem>>, vector<2x128xbf16>
    tpu.vector_store %arg8[%c0_17, %c0_18], %23 {strides = array<i32>} : memref<2x128xbf16, #tpu.memory_space<vmem>>, vector<2x128xbf16>,
    return
  }
  func.func @transform_0(%arg0: i32) -> (i32, i32) {
    %c0_i32 = arith.constant 0 : i32
    %c0_i32_0 = arith.constant 0 : i32
    return %arg0, %c0_i32 : i32, i32
  }
  func.func @transform_1(%arg0: i32) -> (i32, i32) {
    %c0_i32 = arith.constant 0 : i32
    %c0_i32_0 = arith.constant 0 : i32
    %c0_i32_1 = arith.constant 0 : i32
    return %c0_i32, %c0_i32_0 : i32, i32
  }
  func.func @transform_2(%arg0: i32) -> (i32, i32) {
    %c0_i32 = arith.constant 0 : i32
    %c0_i32_0 = arith.constant 0 : i32
    %c0_i32_1 = arith.constant 0 : i32
    return %c0_i32, %c0_i32_0 : i32, i32
  }
  func.func @transform_3(%arg0: i32) -> (i32, i32) {
    %c0_i32 = arith.constant 0 : i32
    %c0_i32_0 = arith.constant 0 : i32
    %c0_i32_1 = arith.constant 0 : i32
    return %c0_i32, %c0_i32_0 : i32, i32
  }
  func.func @transform_4(%arg0: i32) -> (i32, i32) {
    %c0_i32 = arith.constant 0 : i32
    %c0_i32_0 = arith.constant 0 : i32
    %c0_i32_1 = arith.constant 0 : i32
    return %c0_i32, %c0_i32_0 : i32, i32
  }
  func.func @transform_5(%arg0: i32) -> (i32, i32) {
    %c0_i32 = arith.constant 0 : i32
    %c0_i32_0 = arith.constant 0 : i32
    %c0_i32_1 = arith.constant 0 : i32
    return %c0_i32, %c0_i32_0 : i32, i32
  }
  func.func @transform_6(%arg0: i32) -> (i32, i32) {
    %c0_i32 = arith.constant 0 : i32
    %c0_i32_0 = arith.constant 0 : i32
    %c0_i32_1 = arith.constant 0 : i32
    return %c0_i32, %c0_i32_0 : i32, i32
  }
  func.func @transform_7(%arg0: i32) -> (i32, i32) {
    %c0_i32 = arith.constant 0 : i32
    %c0_i32_0 = arith.constant 0 : i32
    return %arg0, %c0_i32 : i32, i32
  }
}

</mosaic_0001>

<bundles_post_ra>
// kernel: tpu_custom_call.1
= control target key start
LH: loop header
LB: loop body
LE: loop exit
PB: predicated region body
PF: predicated region fallthrough
CT: control target
= control target key end

     0   :  { %12 = vsyncpa [#allocation3], 0  ;;  %s4267_s0 = inlined_call_operand.hbm [shape: f32[2,784], index: 0, kind: input, shape index: {}]   ;;  %s4268_s1 = inlined_call_operand.hbm [shape: bf16[784,512], index: 1, kind: input, shape index: {}]   ;;  %s4269_s2 = inlined_call_operand.vmem [shape: f32[1,512], index: 2, kind: input, shape index: {}]   ;;  %s4270_s3 = inlined_call_operand.hbm [shape: bf16[512,512], index: 3, kind: input, shape index: {}]   ;;  %s4271_s4 = inlined_call_operand.vmem [shape: f32[1,512], index: 4, kind: input, shape index: {}]   ;;  %s4272_s5 = inlined_call_operand.hbm [shape: bf16[512,128], index: 5, kind: input, shape index: {}]   ;;  %s4273_s6 = inlined_call_operand.vmem [shape: f32[1,128], index: 6, kind: input, shape index: {}]   ;;  %s4274_s7 = inlined_call_operand.hbm [shape: bf16[2,128], index: 7, kind: output, shape index: {}]  }
   0x1   :  { %13 = vsyncpa [#allocation6], 0 }
   0x2   :  { %14 = vsyncpa [#allocation9], 0 }
   0x3   :  { %15 = vsyncpa [#allocation4], 0  ;;  %s4086_s24 = smov [#allocation5]   ;;  %s3968_s28 = scalar_lea.hbm %s4268_s1, 25088 }
   0x4   :  { %s31_s25 = sshll.u32 %s4086_s24, 4  ;;  %p3969_p0 = scmp.ne.s32.totalorder %s4268_s1, %s3968_s28  ;;  %s32_s25 = int_to_ptr.vmem [resolvable:$true] %s31_s25 }
   0x5   :  { %p3972_p1 = scmp.lt.u32.totalorder %s3968_s28, %s4268_s1 }
   0x7   :  { %p3974_p2 = pnand %p3972_p1, %p3969_p0 }
   0x9   :  { %3977 = shalt.err (!%p3974_p2)
}
   0xa   :  { %s3978_s10 = scalar_lea.vmem %s32_s25, 25088  ;;  %p3983_p4 = scmp.lt.s32.totalorder %s32_s25, %s32_s25 }
   0xb   :  { %p3979_p3 = scmp.ne.s32.totalorder %s32_s25, %s3978_s10  ;;  %p3984_p5 = scmp.lt.s32.totalorder %s3978_s10, %s3978_s10 }
   0xd   :  { %p3985_p6 = por %p3984_p5, %p3983_p4 }
   0xf   :  { %p3986_p7 = pnand %p3985_p6, %p3979_p3 }
  0x11   :  { %3989 = shalt.err (!%p3986_p7)
}
  0x12   :  { %s4087_s11 = smov 256   ;;  %s4088_s12 = smov 16  }
  0x13   :  { %37 = dma.hbm_to_vmem [thread:$0]  %s4268_s1, 25088, %s32_s25, [#allocation6], %s4087_s11, %s4087_s11, %s4088_s12  }
  0x14   :  { %s4089_s15 = smov [#allocation2]   ;;  %s4090_s17 = smov [#allocation7]  }
  0x15   :  { %s22_s16 = sshll.u32 %s4089_s15, 4  ;;  %s45_s18 = sshll.u32 %s4090_s17, 4  ;;  %s23_s16 = int_to_ptr.vmem [resolvable:$true] %s22_s16  ;;  %s46_s18 = int_to_ptr.vmem [resolvable:$true] %s45_s18 }
  0x16   :  { %s3990_s21 = scalar_lea.hbm %s4267_s0, 224 }
  0x17   :  { %p3991_p8 = scmp.ne.s32.totalorder %s4267_s0, %s3990_s21  ;;  %p3994_p9 = scmp.lt.u32.totalorder %s3990_s21, %s4267_s0 }
  0x19   :  { %p3996_p10 = pnand %p3994_p9, %p3991_p8 }
  0x1b   :  { %3999 = shalt.err (!%p3996_p10)
}
  0x1c   :  { %s4000_s1 = scalar_lea.vmem %s23_s16, 224  ;;  %p4005_p12 = scmp.lt.s32.totalorder %s23_s16, %s23_s16 }
  0x1d   :  { %p4001_p11 = scmp.ne.s32.totalorder %s23_s16, %s4000_s1  ;;  %p4006_p13 = scmp.lt.s32.totalorder %s4000_s1, %s4000_s1 }
  0x1f   :  { %p4007_p0 = por %p4006_p13, %p4005_p12 }
  0x21   :  { %p4008_p1 = pnand %p4007_p0, %p4001_p11 }
  0x23   :  { %4011 = shalt.err (!%p4008_p1)
}
  0x24   :  { %25 = dma.hbm_to_vmem [thread:$0]  %s4267_s0, 224, %s23_s16, [#allocation3]  }
  0x25   :  { %s4012_s30 = scalar_lea.hbm %s4270_s3, 16384 }
  0x26   :  { %p4013_p2 = scmp.ne.s32.totalorder %s4270_s3, %s4012_s30  ;;  %p4016_p3 = scmp.lt.u32.totalorder %s4012_s30, %s4270_s3 }
  0x28   :  { %p4018_p4 = pnand %p4016_p3, %p4013_p2 }
  0x2a   :  { %4021 = shalt.err (!%p4018_p4)
}
  0x2b   :  { %s4022_s14 = scalar_lea.vmem %s46_s18, 16384  ;;  %p4027_p6 = scmp.lt.s32.totalorder %s46_s18, %s46_s18 }
  0x2c   :  { %p4023_p5 = scmp.ne.s32.totalorder %s46_s18, %s4022_s14  ;;  %p4028_p7 = scmp.lt.s32.totalorder %s4022_s14, %s4022_s14 }
  0x2e   :  { %p4029_p8 = por %p4028_p7, %p4027_p6 }
  0x30   :  { %p4030_p9 = pnand %p4029_p8, %p4023_p5 }
  0x32   :  { %4033 = shalt.err (!%p4030_p9)
}
  0x33   :  { %51 = dma.hbm_to_vmem [thread:$0]  %s4270_s3, 16384, %s46_s18, [#allocation6], %s4087_s11, %s4087_s11, %s4088_s12  }
  0x34   :  { %s4091_s16 = smov [#allocation8]   ;;  %s4034_s21 = scalar_lea.hbm %s4272_s5, 4096 }
  0x35   :  { %s59_s17 = sshll.u32 %s4091_s16, 4  ;;  %p4035_p10 = scmp.ne.s32.totalorder %s4272_s5, %s4034_s21  ;;  %s60_s17 = int_to_ptr.vmem [resolvable:$true] %s59_s17 }
  0x36   :  { %p4038_p11 = scmp.lt.u32.totalorder %s4034_s21, %s4272_s5 }
  0x38   :  { %p4040_p12 = pnand %p4038_p11, %p4035_p10 }
  0x3a   :  { %4043 = shalt.err (!%p4040_p12)
}
  0x3b   :  { %s4044_s1 = scalar_lea.vmem %s60_s17, 4096  ;;  %p4049_p0 = scmp.lt.s32.totalorder %s60_s17, %s60_s17 }
  0x3c   :  { %p4045_p13 = scmp.ne.s32.totalorder %s60_s17, %s4044_s1  ;;  %p4050_p1 = scmp.lt.s32.totalorder %s4044_s1, %s4044_s1 }
  0x3e   :  { %p4051_p2 = por %p4050_p1, %p4049_p0 }
  0x40   :  { %p4052_p3 = pnand %p4051_p2, %p4045_p13 }
  0x42   :  { %4055 = shalt.err (!%p4052_p3)
}
  0x43   :  { %s4092_s3 = smov 64   ;;  %s4093_s11 = smov 4  }
  0x44   :  { %65 = dma.hbm_to_vmem [thread:$0]  %s4272_s5, 4096, %s60_s17, [#allocation9], %s4092_s3, %s4092_s3, %s4093_s11  }
  0x45   :  { %4078 = dma.done.wait [#allocation3], 224  }
  0x46   :  { %4079 = vsyncadd [#allocation3], 4294967072 }
  0x47   :  { %4080 = dma.done.wait [#allocation6], 41472  }
  0x48   :  { %4081 = vsyncadd [#allocation6], 4294925824 }
  0x49   :  { %4082 = dma.done.wait [#allocation9], 4096  }
  0x4a   :  { %4083 = vsyncadd [#allocation9], 4294963200  ;;  %v3448_v0 = vld [vmem:[#allocation5 + $0x4] ss:$16 sps:$4 sm:$0xff]   ;;  %v3450_v1 = vld [vmem:[#allocation5 + $0xc] ss:$16 sps:$4 sm:$0xff]   ;;  %v89_v38 = vlaneseq }
  0x4b   :  { %1334 = vmatprep.subr.bf16.mxu0 %v3448_v0  ;;  %v3452_v2 = vld [vmem:[#allocation5] ss:$16 sps:$4 sm:$0xff]   ;;  %v3453_v3 = vld [vmem:[#allocation5 + $0x8] ss:$16 sps:$4 sm:$0xff]   ;;  %1498 = vmatprep.subr.bf16.mxu1 %v3450_v1  ;;  %v3454_v4 = vld [vmem:[#allocation5 + $0x24] ss:$16 sps:$4 sm:$0xff]  }
  0x4c   :  { %1335 = vmatpush1.bf16.msra.mxu0 %v3452_v2  ;;  %1499 = vmatpush1.bf16.msra.mxu1 %v3453_v3  ;;  %v3456_v5 = vld [vmem:[#allocation5 + $0x2c] ss:$16 sps:$4 sm:$0xff]   ;;  %v3458_v6 = vld [vmem:[#allocation5 + $0x20] ss:$16 sps:$4 sm:$0xff]   ;;  %v3459_v7 = vld [vmem:[#allocation5 + $0x28] ss:$16 sps:$4 sm:$0xff]  }
  0x4d   :  { %1336 = vmatprep.subr.bf16.mxu0 %v3454_v4  ;;  %1500 = vmatprep.subr.bf16.mxu1 %v3456_v5  ;;  %v3460_v8 = vld [vmem:[#allocation5 + $0x44] ss:$16 sps:$4 sm:$0xff]   ;;  %v3462_v9 = vld [vmem:[#allocation5 + $0x4c] ss:$16 sps:$4 sm:$0xff]   ;;  %v3464_v10 = vld [vmem:[#allocation5 + $0x40] ss:$16 sps:$4 sm:$0xff]  }
  0x4e   :  { %v3465_v11 = vld [vmem:[#allocation5 + $0x48] ss:$16 sps:$4 sm:$0xff]   ;;  %v3466_v12 = vld [vmem:[#allocation5 + $0x64] ss:$16 sps:$4 sm:$0xff]   ;;  %v3468_v13 = vld [vmem:[#allocation5 + $0x6c] ss:$16 sps:$4 sm:$0xff]  }
  0x4f   :  { %v3470_v14 = vld [vmem:[#allocation5 + $0x60] ss:$16 sps:$4 sm:$0xff]   ;;  %v3471_v15 = vld [vmem:[#allocation5 + $0x68] ss:$16 sps:$4 sm:$0xff]   ;;  %v3472_v16 = vld [vmem:[#allocation5 + $0x84] ss:$16 sps:$4 sm:$0xff]  }
  0x50   :  { %1337 = vmatpush1.bf16.msra.mxu0 %v3458_v6  ;;  %1501 = vmatpush1.bf16.msra.mxu1 %v3459_v7  ;;  %v3474_v17 = vld [vmem:[#allocation5 + $0x8c] ss:$16 sps:$4 sm:$0xff]   ;;  %v3476_v18 = vld [vmem:[#allocation5 + $0x80] ss:$16 sps:$4 sm:$0xff]   ;;  %v3477_v19 = vld [vmem:[#allocation5 + $0x88] ss:$16 sps:$4 sm:$0xff]  }
  0x51   :  { %1338 = vmatprep.subr.bf16.mxu0 %v3460_v8  ;;  %1502 = vmatprep.subr.bf16.mxu1 %v3462_v9  ;;  %v3478_v20 = vld [vmem:[#allocation5 + $0xa4] ss:$16 sps:$4 sm:$0xff]   ;;  %v3480_v21 = vld [vmem:[#allocation5 + $0xac] ss:$16 sps:$4 sm:$0xff]   ;;  %v3482_v22 = vld [vmem:[#allocation5 + $0xa0] ss:$16 sps:$4 sm:$0xff]  }
  0x52   :  { %v3483_v23 = vld [vmem:[#allocation5 + $0xa8] ss:$16 sps:$4 sm:$0xff]   ;;  %v3484_v24 = vld [vmem:[#allocation5 + $0xc4] ss:$16 sps:$4 sm:$0xff]   ;;  %v3486_v25 = vld [vmem:[#allocation5 + $0xcc] ss:$16 sps:$4 sm:$0xff]  }
  0x53   :  { %v3488_v26 = vld [vmem:[#allocation5 + $0xc0] ss:$16 sps:$4 sm:$0xff]   ;;  %v3489_v27 = vld [vmem:[#allocation5 + $0xc8] ss:$16 sps:$4 sm:$0xff]   ;;  %v3490_v28 = vld [vmem:[#allocation5 + $0xe4] ss:$16 sps:$4 sm:$0xff]  }
  0x54   :  { %1339 = vmatpush1.bf16.msra.mxu0 %v3464_v10  ;;  %1503 = vmatpush1.bf16.msra.mxu1 %v3465_v11  ;;  %v3492_v29 = vld [vmem:[#allocation5 + $0xec] ss:$16 sps:$4 sm:$0xff]   ;;  %v3494_v30 = vld [vmem:[#allocation5 + $0xe0] ss:$16 sps:$4 sm:$0xff]   ;;  %v3495_v31 = vld [vmem:[#allocation5 + $0xe8] ss:$16 sps:$4 sm:$0xff]  }
  0x55   :  { %1340 = vmatprep.subr.bf16.mxu0 %v3466_v12  ;;  %1504 = vmatprep.subr.bf16.mxu1 %v3468_v13  ;;  %v3496_v32 = vld [vmem:[#allocation5 + $0x104] ss:$16 sps:$4 sm:$0xff]   ;;  %v3498_v33 = vld [vmem:[#allocation5 + $0x10c] ss:$16 sps:$4 sm:$0xff]   ;;  %v3500_v34 = vld [vmem:[#allocation5 + $0x100] ss:$16 sps:$4 sm:$0xff]  }
  0x56   :  { %v3501_v35 = vld [vmem:[#allocation5 + $0x108] ss:$16 sps:$4 sm:$0xff]   ;;  %v4094_v36 = vmov 1983009808   ;;  %v3502_v39 = vld [vmem:[#allocation5 + $0x124] ss:$16 sps:$4 sm:$0xff]  }
  0x57   :  { %v87_v37 = vunpack.c.l.s4 %v4094_v36  ;;  %v3504_v40 = vld [vmem:[#allocation5 + $0x12c] ss:$16 sps:$4 sm:$0xff]   ;;  %v3506_v41 = vld [vmem:[#allocation5 + $0x120] ss:$16 sps:$4 sm:$0xff]   ;;  %v4191_v43 = vshrl.u32 %v89_v38, 7  ;;  %vm1330_vm0 = vcmask 130048  }
  0x58   :  { %1341 = vmatpush1.bf16.msra.mxu0 %v3470_v14  ;;  %1505 = vmatpush1.bf16.msra.mxu1 %v3471_v15  ;;  %v3507_v44 = vld [vmem:[#allocation5 + $0x128] ss:$16 sps:$4 sm:$0xff]   ;;  %v3508_v45 = vld [vmem:[#allocation5 + $0x144] ss:$16 sps:$4 sm:$0xff]   ;;  %v3510_v46 = vld [vmem:[#allocation5 + $0x14c] ss:$16 sps:$4 sm:$0xff]  }
  0x59   :  { %1342 = vmatprep.subr.bf16.mxu0 %v3472_v16  ;;  %1506 = vmatprep.subr.bf16.mxu1 %v3474_v17  ;;  %v88_v42 = vunpack.c.0.s8 %v87_v37  ;;  %v3512_v47 = vld [vmem:[#allocation5 + $0x140] ss:$16 sps:$4 sm:$0xff]   ;;  %v3513_v48 = vld [vmem:[#allocation5 + $0x148] ss:$16 sps:$4 sm:$0xff]   ;;  %v3514_v50 = vld [vmem:[#allocation5 + $0x164] ss:$16 sps:$4 sm:$0xff]  }
  0x5a   :  { %v3516_v51 = vld [vmem:[#allocation5 + $0x16c] ss:$16 sps:$4 sm:$0xff]   ;;  %v81_v52 = vld [vmem:[#allocation2] sm:$0xff]  ;;  %s4096_s29 = smov [#allocation10]  }
  0x5b   :  { %v4194_v49 = vsub.s32 %v88_v42, %v4191_v43  ;;  %v3518_v53 = vld [vmem:[#allocation5 + $0x160] ss:$16 sps:$4 sm:$0xff]   ;;  %v3519_v55 = vld [vmem:[#allocation5 + $0x168] ss:$16 sps:$4 sm:$0xff]   ;;  %v3520_v56 = vld [vmem:[#allocation5 + $0x184] ss:$16 sps:$4 sm:$0xff]   ;;  %v85_v4 = vcombine.high %v81_v52, %v81_v52 }
  0x5c   :  { %1343 = vmatpush1.bf16.msra.mxu0 %v3476_v18  ;;  %1507 = vmatpush1.bf16.msra.mxu1 %v3477_v19  ;;  %v3522_v57 = vld [vmem:[#allocation5 + $0x18c] ss:$16 sps:$4 sm:$0xff]   ;;  %v3524_v59 = vld [vmem:[#allocation5 + $0x180] ss:$16 sps:$4 sm:$0xff]   ;;  %v3525_v61 = vld [vmem:[#allocation5 + $0x188] ss:$16 sps:$4 sm:$0xff]  }
  0x5d   :  { %1344 = vmatprep.subr.bf16.mxu0 %v3478_v20  ;;  %1508 = vmatprep.subr.bf16.mxu1 %v3480_v21  ;;  %v92_v54 = vrot.slane %v81_v52, %v4194_v49  ;;  %v3526_v62 = vld [vmem:[#allocation5 + $0x1a4] ss:$16 sps:$4 sm:$0xff]   ;;  %v3528_v63 = vld [vmem:[#allocation5 + $0x1ac] ss:$16 sps:$4 sm:$0xff]   ;;  %v3530_v0 = vld [vmem:[#allocation5 + $0x1a0] ss:$16 sps:$4 sm:$0xff]   ;;  %v4198_v9 = vrot.slane %v85_v4, %v4194_v49 }
  0x5e   :  { %v3531_v1 = vld [vmem:[#allocation5 + $0x1a8] ss:$16 sps:$4 sm:$0xff]   ;;  %v3532_v2 = vld [vmem:[#allocation5 + $0x1c4] ss:$16 sps:$4 sm:$0xff]   ;;  %v3534_v3 = vld [vmem:[#allocation5 + $0x1cc] ss:$16 sps:$4 sm:$0xff]  }
  0x5f   :  { %v100_v58 = vcombine.high %v92_v54, %v92_v54  ;;  %v3536_v5 = vld [vmem:[#allocation5 + $0x1c0] ss:$16 sps:$4 sm:$0xff]   ;;  %v3537_v6 = vld [vmem:[#allocation5 + $0x1c8] ss:$16 sps:$4 sm:$0xff]   ;;  %v3538_v7 = vld [vmem:[#allocation5 + $0x1e4] ss:$16 sps:$4 sm:$0xff]   ;;  %v101_v14 = vcombine.high %v4198_v9, %v4198_v9  ;;  %v125_v16 = vpack.c.bf16 %v92_v54, %v92_v54 }
  0x60   :  { %1345 = vmatpush1.bf16.msra.mxu0 %v3482_v22  ;;  %1509 = vmatpush1.bf16.msra.mxu1 %v3483_v23  ;;  %v3540_v8 = vld [vmem:[#allocation5 + $0x1ec] ss:$16 sps:$4 sm:$0xff]   ;;  %v3542_v10 = vld [vmem:[#allocation5 + $0x1e0] ss:$16 sps:$4 sm:$0xff]   ;;  %v3543_v11 = vld [vmem:[#allocation5 + $0x1e8] ss:$16 sps:$4 sm:$0xff]  }
  0x61   :  { %1346 = vmatprep.subr.bf16.mxu0 %v3484_v24  ;;  %1510 = vmatprep.subr.bf16.mxu1 %v3486_v25  ;;  %v126_v60 = vpack.c.bf16 %v100_v58, %v100_v58  ;;  %v3547_v12 = vld [vmem:[#allocation5 + $0x204] ss:$16 sps:$4 sm:$0xff]   ;;  %v3550_v13 = vld [vmem:[#allocation5 + $0x20c] ss:$16 sps:$4 sm:$0xff]   ;;  %v3545_v15 = vld [vmem:[#allocation5 + $0x200] ss:$16 sps:$4 sm:$0xff]   ;;  %v128_v20 = vpack.c.bf16 %v101_v14, %v101_v14 }
  0x62   :  { %v3548_v17 = vld [vmem:[#allocation5 + $0x208] ss:$16 sps:$4 sm:$0xff]   ;;  %v3553_v18 = vld [vmem:[#allocation5 + $0x224] ss:$16 sps:$4 sm:$0xff]   ;;  %v3556_v19 = vld [vmem:[#allocation5 + $0x22c] ss:$16 sps:$4 sm:$0xff]  }
  0x63   :  { %1366 = vmatprep.mubr.bf16.mxu0 %v126_v60  ;;  %1530 = vmatprep.mubr.bf16.mxu1 %v126_v60  ;;  %v3551_v21 = vld [vmem:[#allocation5 + $0x220] ss:$16 sps:$4 sm:$0xff]   ;;  %v3554_v22 = vld [vmem:[#allocation5 + $0x228] ss:$16 sps:$4 sm:$0xff]   ;;  %v3559_v23 = vld [vmem:[#allocation5 + $0x244] ss:$16 sps:$4 sm:$0xff]  }
  0x64   :  { %1347 = vmatpush1.bf16.msra.mxu0 %v3488_v26  ;;  %1511 = vmatpush1.bf16.msra.mxu1 %v3489_v27  ;;  %v3562_v24 = vld [vmem:[#allocation5 + $0x24c] ss:$16 sps:$4 sm:$0xff]   ;;  %v3557_v25 = vld [vmem:[#allocation5 + $0x240] ss:$16 sps:$4 sm:$0xff]   ;;  %v3560_v26 = vld [vmem:[#allocation5 + $0x248] ss:$16 sps:$4 sm:$0xff]  }
  0x65   :  { %1348 = vmatprep.subr.bf16.mxu0 %v3490_v28  ;;  %1512 = vmatprep.subr.bf16.mxu1 %v3492_v29  ;;  %v3565_v27 = vld [vmem:[#allocation5 + $0x264] ss:$16 sps:$4 sm:$0xff]   ;;  %v3568_v28 = vld [vmem:[#allocation5 + $0x26c] ss:$16 sps:$4 sm:$0xff]   ;;  %v3563_v29 = vld [vmem:[#allocation5 + $0x260] ss:$16 sps:$4 sm:$0xff]  }
  0x66   :  { %v3580_v36 = vld [vmem:[#allocation5 + $0x2ac] ss:$16 sps:$4 sm:$0xff]   ;;  %v3575_v37 = vld [vmem:[#allocation5 + $0x2a0] ss:$16 sps:$4 sm:$0xff]   ;;  %v3578_v38 = vld [vmem:[#allocation5 + $0x2a8] ss:$16 sps:$4 sm:$0xff]  }
  0x67   :  { %v3584_v42 = vld [vmem:[#allocation5 + $0x2c8] ss:$16 sps:$4 sm:$0xff]   ;;  %v3604_v54 = vld [vmem:[#allocation5 + $0x32c] ss:$16 sps:$4 sm:$0xff]   ;;  %v3637_v14 = vld [vmem:[#allocation5 + $0x3e4] ss:$16 sps:$4 sm:$0xff]  }
  0x68   :  { %1349 = vmatpush1.bf16.msra.mxu0 %v3494_v30  ;;  %1513 = vmatpush1.bf16.msra.mxu1 %v3495_v31  ;;  %v3566_v30 = vld [vmem:[#allocation5 + $0x268] ss:$16 sps:$4 sm:$0xff]   ;;  %v3571_v31 = vld [vmem:[#allocation5 + $0x284] ss:$16 sps:$4 sm:$0xff]   ;;  %v3610_v58 = vld [vmem:[#allocation5 + $0x34c] ss:$16 sps:$4 sm:$0xff]  }
  0x69   :  { %1350 = vmatprep.subr.bf16.mxu0 %v3496_v32  ;;  %1514 = vmatprep.subr.bf16.mxu1 %v3498_v33  ;;  %v3574_v32 = vld [vmem:[#allocation5 + $0x28c] ss:$16 sps:$4 sm:$0xff]   ;;  %v3569_v33 = vld [vmem:[#allocation5 + $0x280] ss:$16 sps:$4 sm:$0xff]   ;;  %v3596_v52 = vld [vmem:[#allocation5 + $0x308] ss:$16 sps:$4 sm:$0xff]  }
  0x6a   :  { %v3608_v60 = vld [vmem:[#allocation5 + $0x348] ss:$16 sps:$4 sm:$0xff]   ;;  %s2983_s30 = sshll.u32 %s4096_s29, 4  ;;  %s2984_s30 = int_to_ptr.vmem [resolvable:$true] %s2983_s30 }
  0x6b   :  { %v3620_v4 = vld [vmem:[#allocation5 + $0x388] ss:$16 sps:$4 sm:$0xff]   ;;  %s4056_s8 = scalar_lea.vmem %s2984_s30, 16  ;;  %s4060_s9 = scalar_lea.vmem %s2984_s30, 32 }
  0x6c   :  { %1351 = vmatpush1.bf16.msra.mxu0 %v3500_v34  ;;  %1515 = vmatpush1.bf16.msra.mxu1 %v3501_v35  ;;  %v3572_v34 = vld [vmem:[#allocation5 + $0x288] ss:$16 sps:$4 sm:$0xff]   ;;  %v3577_v35 = vld [vmem:[#allocation5 + $0x2a4] ss:$16 sps:$4 sm:$0xff]   ;;  %p4057_p4 = scmp.ne.s32.totalorder %s2984_s30, %s4056_s8  ;;  %p4061_p5 = scmp.lt.s32.totalorder %s2984_s30, %s2984_s30 }
  0x6d   :  { %1352 = vmatprep.subr.bf16.mxu0 %v3502_v39  ;;  %1516 = vmatprep.subr.bf16.mxu1 %v3504_v40  ;;  %v3583_v39 = vld [vmem:[#allocation5 + $0x2c4] ss:$16 sps:$4 sm:$0xff]   ;;  %v3586_v40 = vld [vmem:[#allocation5 + $0x2cc] ss:$16 sps:$4 sm:$0xff]   ;;  %p4062_p6 = scmp.lt.s32.totalorder %s4060_s9, %s4056_s8 }
  0x6f   :  { %p4063_p7 = por %p4062_p6, %p4061_p5 }
  0x70   :  { %1353 = vmatpush1.bf16.msra.mxu0 %v3506_v41  ;;  %1517 = vmatpush1.bf16.msra.mxu1 %v3507_v44  ;;  %v3581_v41 = vld [vmem:[#allocation5 + $0x2c0] ss:$16 sps:$4 sm:$0xff]   ;;  %v3589_v44 = vld [vmem:[#allocation5 + $0x2e4] ss:$16 sps:$4 sm:$0xff]  }
  0x71   :  { %1354 = vmatprep.subr.bf16.mxu0 %v3508_v45  ;;  %1518 = vmatprep.subr.bf16.mxu1 %v3510_v46  ;;  %v3592_v45 = vld [vmem:[#allocation5 + $0x2ec] ss:$16 sps:$4 sm:$0xff]   ;;  %v3587_v46 = vld [vmem:[#allocation5 + $0x2e0] ss:$16 sps:$4 sm:$0xff]   ;;  %p4064_p8 = pnand %p4063_p7, %p4057_p4 }
  0x74   :  { %1355 = vmatpush1.bf16.msra.mxu0 %v3512_v47  ;;  %1519 = vmatpush1.bf16.msra.mxu1 %v3513_v48  ;;  %v3590_v47 = vld [vmem:[#allocation5 + $0x2e8] ss:$16 sps:$4 sm:$0xff]   ;;  %v3595_v48 = vld [vmem:[#allocation5 + $0x304] ss:$16 sps:$4 sm:$0xff]  }
  0x75   :  { %1356 = vmatprep.subr.bf16.mxu0 %v3514_v50  ;;  %1520 = vmatprep.subr.bf16.mxu1 %v3516_v51  ;;  %v3598_v50 = vld [vmem:[#allocation5 + $0x30c] ss:$16 sps:$4 sm:$0xff]   ;;  %v3593_v51 = vld [vmem:[#allocation5 + $0x300] ss:$16 sps:$4 sm:$0xff]  }
  0x78   :  { %1357 = vmatpush1.bf16.msra.mxu0 %v3518_v53  ;;  %1521 = vmatpush1.bf16.msra.mxu1 %v3519_v55  ;;  %v3601_v53 = vld [vmem:[#allocation5 + $0x324] ss:$16 sps:$4 sm:$0xff]   ;;  %v3599_v55 = vld [vmem:[#allocation5 + $0x320] ss:$16 sps:$4 sm:$0xff]  }
  0x79   :  { %1358 = vmatprep.subr.bf16.mxu0 %v3520_v56  ;;  %1522 = vmatprep.subr.bf16.mxu1 %v3522_v57  ;;  %v3602_v56 = vld [vmem:[#allocation5 + $0x328] ss:$16 sps:$4 sm:$0xff]   ;;  %v3607_v57 = vld [vmem:[#allocation5 + $0x344] ss:$16 sps:$4 sm:$0xff]  }
  0x7c   :  { %1359 = vmatpush1.bf16.msra.mxu0 %v3524_v59  ;;  %1523 = vmatpush1.bf16.msra.mxu1 %v3525_v61  ;;  %v3605_v59 = vld [vmem:[#allocation5 + $0x340] ss:$16 sps:$4 sm:$0xff]   ;;  %v3613_v61 = vld [vmem:[#allocation5 + $0x364] ss:$16 sps:$4 sm:$0xff]  }
  0x7d   :  { %1360 = vmatprep.subr.bf16.mxu0 %v3526_v62  ;;  %1524 = vmatprep.subr.bf16.mxu1 %v3528_v63  ;;  %v3616_v62 = vld [vmem:[#allocation5 + $0x36c] ss:$16 sps:$4 sm:$0xff]   ;;  %v3611_v63 = vld [vmem:[#allocation5 + $0x360] ss:$16 sps:$4 sm:$0xff]  }
  0x80   :  { %1361 = vmatpush1.bf16.msra.mxu0 %v3530_v0  ;;  %1525 = vmatpush1.bf16.msra.mxu1 %v3531_v1  ;;  %v3614_v0 = vld [vmem:[#allocation5 + $0x368] ss:$16 sps:$4 sm:$0xff]   ;;  %v3619_v1 = vld [vmem:[#allocation5 + $0x384] ss:$16 sps:$4 sm:$0xff]  }
  0x81   :  { %1362 = vmatprep.subr.bf16.mxu0 %v3532_v2  ;;  %1526 = vmatprep.subr.bf16.mxu1 %v3534_v3  ;;  %v3622_v2 = vld [vmem:[#allocation5 + $0x38c] ss:$16 sps:$4 sm:$0xff]   ;;  %v3617_v3 = vld [vmem:[#allocation5 + $0x380] ss:$16 sps:$4 sm:$0xff]  }
  0x84   :  { %1363 = vmatpush1.bf16.msra.mxu0 %v3536_v5  ;;  %1527 = vmatpush1.bf16.msra.mxu1 %v3537_v6  ;;  %v3625_v5 = vld [vmem:[#allocation5 + $0x3a4] ss:$16 sps:$4 sm:$0xff]   ;;  %v3628_v6 = vld [vmem:[#allocation5 + $0x3ac] ss:$16 sps:$4 sm:$0xff]  }
  0x85   :  { %1364 = vmatprep.subr.bf16.mxu0 %v3538_v7  ;;  %1528 = vmatprep.subr.bf16.mxu1 %v3540_v8  ;;  %v3623_v7 = vld [vmem:[#allocation5 + $0x3a0] ss:$16 sps:$4 sm:$0xff]   ;;  %v3626_v8 = vld [vmem:[#allocation5 + $0x3a8] ss:$16 sps:$4 sm:$0xff]  }
  0x88   :  { %1365 = vmatpush1.bf16.msra.mxu0 %v3542_v10  ;;  %1529 = vmatpush1.bf16.msra.mxu1 %v3543_v11  ;;  %v3631_v10 = vld [vmem:[#allocation5 + $0x3c4] ss:$16 sps:$4 sm:$0xff]   ;;  %v3634_v11 = vld [vmem:[#allocation5 + $0x3cc] ss:$16 sps:$4 sm:$0xff]  }
  0x89   :  { %1375 = vmatprep.subr.bf16.mxu0 %v3547_v12  ;;  %1539 = vmatprep.subr.bf16.mxu1 %v3550_v13  ;;  %v3629_v12 = vld [vmem:[#allocation5 + $0x3c0] ss:$16 sps:$4 sm:$0xff]   ;;  %v3632_v13 = vld [vmem:[#allocation5 + $0x3c8] ss:$16 sps:$4 sm:$0xff]  }
  0x8b   :  { %1367 = vmatmul.mubr.bf16.vlgmr.msra.gmra.mrb[0].mxu0 %v125_v16  ;;  %1531 = vmatmul.mubr.bf16.vlgmr.msra.gmra.mrb[0].mxu1 %v125_v16  ;;  %v3635_v16 = vld [vmem:[#allocation5 + $0x3e0] ss:$16 sps:$4 sm:$0xff]  }
  0x8c   :  { %1376 = vmatpush1.bf16.msra.mxu0 %v3545_v15  ;;  %1540 = vmatpush1.bf16.msra.mxu1 %v3548_v17  ;;  %v3640_v15 = vld [vmem:[#allocation5 + $0x3ec] ss:$16 sps:$4 sm:$0xff]   ;;  %v3638_v17 = vld [vmem:[#allocation5 + $0x3e8] ss:$16 sps:$4 sm:$0xff]  }
  0x8d   :  { %1377 = vmatprep.subr.bf16.mxu0 %v3553_v18  ;;  %1541 = vmatprep.subr.bf16.mxu1 %v3556_v19  ;;  %v3643_v18 = vld [vmem:[#allocation5 + $0x404] ss:$16 sps:$4 sm:$0xff]   ;;  %v3646_v19 = vld [vmem:[#allocation5 + $0x40c] ss:$16 sps:$4 sm:$0xff]  }
  0x8e   :  { %1407 = vmatprep.mubr.bf16.mxu0 %v128_v20  ;;  %1571 = vmatprep.mubr.bf16.mxu1 %v128_v20  ;;  %v3641_v20 = vld [vmem:[#allocation5 + $0x400] ss:$16 sps:$4 sm:$0xff]  }
  0x90   :  { %1378 = vmatpush1.bf16.msra.mxu0 %v3551_v21  ;;  %1542 = vmatpush1.bf16.msra.mxu1 %v3554_v22  ;;  %v127_v21 = vpack.c.bf16 %v4198_v9, %v4198_v9  ;;  %v3644_v22 = vld [vmem:[#allocation5 + $0x408] ss:$16 sps:$4 sm:$0xff]   ;;  %v3647_v9 = vld [vmem:[#allocation5 + $0x420] ss:$16 sps:$4 sm:$0xff]  }
  0x91   :  { %1379 = vmatprep.subr.bf16.mxu0 %v3559_v23  ;;  %1543 = vmatprep.subr.bf16.mxu1 %v3562_v24  ;;  %v4204_v23 = vld [vmem:[#allocation2 + $0x8] sm:$0x3f]  ;;  %v3649_v24 = vld [vmem:[#allocation5 + $0x424] ss:$16 sps:$4 sm:$0xff]  }
  0x94   :  { %1380 = vmatpush1.bf16.msra.mxu0 %v3557_v25  ;;  %1544 = vmatpush1.bf16.msra.mxu1 %v3560_v26  ;;  %v3652_v25 = vld [vmem:[#allocation5 + $0x42c] ss:$16 sps:$4 sm:$0xff]   ;;  %v4208_v26 = vrot.slane %v4204_v23, %v4194_v49 }
  0x95   :  { %1381 = vmatprep.subr.bf16.mxu0 %v3565_v27  ;;  %1545 = vmatprep.subr.bf16.mxu1 %v3568_v28  ;;  %v3650_v28 = vld [vmem:[#allocation5 + $0x428] ss:$16 sps:$4 sm:$0xff]  }
  0x96   :  { %v117_v27 = vcombine.high %v4208_v26, %v4208_v26 }
  0x98   :  { %1382 = vmatpush1.bf16.msra.mxu0 %v3563_v29  ;;  %1546 = vmatpush1.bf16.msra.mxu1 %v3566_v30  ;;  %v3655_v29 = vld [vmem:[#allocation5 + $0x444] ss:$16 sps:$4 sm:$0xff]   ;;  %v3658_v30 = vld [vmem:[#allocation5 + $0x44c] ss:$16 sps:$4 sm:$0xff]  }
  0x99   :  { %1383 = vmatprep.subr.bf16.mxu0 %v3571_v31  ;;  %1547 = vmatprep.subr.bf16.mxu1 %v3574_v32  ;;  %v130_v31 = vpack.c.bf16 %v117_v27, %v117_v27  ;;  %v3653_v32 = vld [vmem:[#allocation5 + $0x440] ss:$16 sps:$4 sm:$0xff]   ;;  %v3740_v27 = vld [vmem:[#allocation5 + $0x604] ss:$16 sps:$4 sm:$0xff]  }
  0x9c   :  { %1384 = vmatpush1.bf16.msra.mxu0 %v3569_v33  ;;  %1548 = vmatpush1.bf16.msra.mxu1 %v3572_v34  ;;  %v3656_v33 = vld [vmem:[#allocation5 + $0x448] ss:$16 sps:$4 sm:$0xff]   ;;  %v3661_v34 = vld [vmem:[#allocation5 + $0x464] ss:$16 sps:$4 sm:$0xff]  }
  0x9d   :  { %1385 = vmatprep.subr.bf16.mxu0 %v3577_v35  ;;  %1549 = vmatprep.subr.bf16.mxu1 %v3580_v36  ;;  %v3664_v35 = vld [vmem:[#allocation5 + $0x46c] ss:$16 sps:$4 sm:$0xff]   ;;  %v3659_v36 = vld [vmem:[#allocation5 + $0x460] ss:$16 sps:$4 sm:$0xff]  }
  0xa0   :  { %1386 = vmatpush1.bf16.msra.mxu0 %v3575_v37  ;;  %1550 = vmatpush1.bf16.msra.mxu1 %v3578_v38  ;;  %v3662_v37 = vld [vmem:[#allocation5 + $0x468] ss:$16 sps:$4 sm:$0xff]   ;;  %v3667_v38 = vld [vmem:[#allocation5 + $0x484] ss:$16 sps:$4 sm:$0xff]  }
  0xa1   :  { %1387 = vmatprep.subr.bf16.mxu0 %v3583_v39  ;;  %1551 = vmatprep.subr.bf16.mxu1 %v3586_v40  ;;  %v3670_v39 = vld [vmem:[#allocation5 + $0x48c] ss:$16 sps:$4 sm:$0xff]   ;;  %v3665_v40 = vld [vmem:[#allocation5 + $0x480] ss:$16 sps:$4 sm:$0xff]  }
  0xa4   :  { %1388 = vmatpush1.bf16.msra.mxu0 %v3581_v41  ;;  %1552 = vmatpush1.bf16.msra.mxu1 %v3584_v42  ;;  %v3668_v41 = vld [vmem:[#allocation5 + $0x488] ss:$16 sps:$4 sm:$0xff]   ;;  %v3673_v42 = vld [vmem:[#allocation5 + $0x4a4] ss:$16 sps:$4 sm:$0xff]  }
  0xa5   :  { %1389 = vmatprep.subr.bf16.mxu0 %v3589_v44  ;;  %1553 = vmatprep.subr.bf16.mxu1 %v3592_v45  ;;  %v3676_v44 = vld [vmem:[#allocation5 + $0x4ac] ss:$16 sps:$4 sm:$0xff]   ;;  %v3671_v45 = vld [vmem:[#allocation5 + $0x4a0] ss:$16 sps:$4 sm:$0xff]  }
  0xa8   :  { %1390 = vmatpush1.bf16.msra.mxu0 %v3587_v46  ;;  %1554 = vmatpush1.bf16.msra.mxu1 %v3590_v47  ;;  %v3674_v46 = vld [vmem:[#allocation5 + $0x4a8] ss:$16 sps:$4 sm:$0xff]   ;;  %v3679_v47 = vld [vmem:[#allocation5 + $0x4c4] ss:$16 sps:$4 sm:$0xff]  }
  0xa9   :  { %1391 = vmatprep.subr.bf16.mxu0 %v3595_v48  ;;  %1555 = vmatprep.subr.bf16.mxu1 %v3598_v50  ;;  %v3682_v48 = vld [vmem:[#allocation5 + $0x4cc] ss:$16 sps:$4 sm:$0xff]   ;;  %v3677_v50 = vld [vmem:[#allocation5 + $0x4c0] ss:$16 sps:$4 sm:$0xff]  }
  0xac   :  { %1392 = vmatpush1.bf16.msra.mxu0 %v3593_v51  ;;  %1556 = vmatpush1.bf16.msra.mxu1 %v3596_v52  ;;  %v3680_v51 = vld [vmem:[#allocation5 + $0x4c8] ss:$16 sps:$4 sm:$0xff]   ;;  %v3685_v52 = vld [vmem:[#allocation5 + $0x4e4] ss:$16 sps:$4 sm:$0xff]  }
  0xad   :  { %1393 = vmatprep.subr.bf16.mxu0 %v3601_v53  ;;  %1557 = vmatprep.subr.bf16.mxu1 %v3604_v54  ;;  %v3688_v53 = vld [vmem:[#allocation5 + $0x4ec] ss:$16 sps:$4 sm:$0xff]   ;;  %v3683_v54 = vld [vmem:[#allocation5 + $0x4e0] ss:$16 sps:$4 sm:$0xff]  }
  0xb0   :  { %1394 = vmatpush1.bf16.msra.mxu0 %v3599_v55  ;;  %1558 = vmatpush1.bf16.msra.mxu1 %v3602_v56  ;;  %v3686_v55 = vld [vmem:[#allocation5 + $0x4e8] ss:$16 sps:$4 sm:$0xff]   ;;  %v3691_v56 = vld [vmem:[#allocation5 + $0x504] ss:$16 sps:$4 sm:$0xff]  }
  0xb1   :  { %1395 = vmatprep.subr.bf16.mxu0 %v3607_v57  ;;  %1559 = vmatprep.subr.bf16.mxu1 %v3610_v58  ;;  %v3694_v57 = vld [vmem:[#allocation5 + $0x50c] ss:$16 sps:$4 sm:$0xff]   ;;  %v3689_v58 = vld [vmem:[#allocation5 + $0x500] ss:$16 sps:$4 sm:$0xff]  }
  0xb4   :  { %1396 = vmatpush1.bf16.msra.mxu0 %v3605_v59  ;;  %1560 = vmatpush1.bf16.msra.mxu1 %v3608_v60  ;;  %v3692_v59 = vld [vmem:[#allocation5 + $0x508] ss:$16 sps:$4 sm:$0xff]   ;;  %v3697_v60 = vld [vmem:[#allocation5 + $0x524] ss:$16 sps:$4 sm:$0xff]  }
  0xb5   :  { %1397 = vmatprep.subr.bf16.mxu0 %v3613_v61  ;;  %1561 = vmatprep.subr.bf16.mxu1 %v3616_v62  ;;  %v3700_v61 = vld [vmem:[#allocation5 + $0x52c] ss:$16 sps:$4 sm:$0xff]   ;;  %v3695_v62 = vld [vmem:[#allocation5 + $0x520] ss:$16 sps:$4 sm:$0xff]  }
  0xb8   :  { %1398 = vmatpush1.bf16.msra.mxu0 %v3611_v63  ;;  %1562 = vmatpush1.bf16.msra.mxu1 %v3614_v0  ;;  %v3698_v63 = vld [vmem:[#allocation5 + $0x528] ss:$16 sps:$4 sm:$0xff]   ;;  %v3703_v0 = vld [vmem:[#allocation5 + $0x544] ss:$16 sps:$4 sm:$0xff]  }
  0xb9   :  { %1399 = vmatprep.subr.bf16.mxu0 %v3619_v1  ;;  %1563 = vmatprep.subr.bf16.mxu1 %v3622_v2  ;;  %v3706_v1 = vld [vmem:[#allocation5 + $0x54c] ss:$16 sps:$4 sm:$0xff]   ;;  %v3701_v2 = vld [vmem:[#allocation5 + $0x540] ss:$16 sps:$4 sm:$0xff]  }
  0xbc   :  { %1400 = vmatpush1.bf16.msra.mxu0 %v3617_v3  ;;  %1564 = vmatpush1.bf16.msra.mxu1 %v3620_v4  ;;  %v3704_v3 = vld [vmem:[#allocation5 + $0x548] ss:$16 sps:$4 sm:$0xff]   ;;  %v3709_v4 = vld [vmem:[#allocation5 + $0x564] ss:$16 sps:$4 sm:$0xff]  }
  0xbd   :  { %1401 = vmatprep.subr.bf16.mxu0 %v3625_v5  ;;  %1565 = vmatprep.subr.bf16.mxu1 %v3628_v6  ;;  %v3712_v5 = vld [vmem:[#allocation5 + $0x56c] ss:$16 sps:$4 sm:$0xff]   ;;  %v3707_v6 = vld [vmem:[#allocation5 + $0x560] ss:$16 sps:$4 sm:$0xff]  }
  0xc0   :  { %1402 = vmatpush1.bf16.msra.mxu0 %v3623_v7  ;;  %1566 = vmatpush1.bf16.msra.mxu1 %v3626_v8  ;;  %v3710_v7 = vld [vmem:[#allocation5 + $0x568] ss:$16 sps:$4 sm:$0xff]   ;;  %v3715_v8 = vld [vmem:[#allocation5 + $0x584] ss:$16 sps:$4 sm:$0xff]  }
  0xc1   :  { %1403 = vmatprep.subr.bf16.mxu0 %v3631_v10  ;;  %1567 = vmatprep.subr.bf16.mxu1 %v3634_v11  ;;  %v3718_v10 = vld [vmem:[#allocation5 + $0x58c] ss:$16 sps:$4 sm:$0xff]   ;;  %v3713_v11 = vld [vmem:[#allocation5 + $0x580] ss:$16 sps:$4 sm:$0xff]  }
  0xc4   :  { %1404 = vmatpush1.bf16.msra.mxu0 %v3629_v12  ;;  %1568 = vmatpush1.bf16.msra.mxu1 %v3632_v13  ;;  %v3716_v12 = vld [vmem:[#allocation5 + $0x588] ss:$16 sps:$4 sm:$0xff]   ;;  %v3721_v13 = vld [vmem:[#allocation5 + $0x5a4] ss:$16 sps:$4 sm:$0xff]  }
  0xc5   :  { %1405 = vmatprep.subr.bf16.mxu0 %v3637_v14  ;;  %1569 = vmatprep.subr.bf16.mxu1 %v3640_v15  ;;  %v3724_v14 = vld [vmem:[#allocation5 + $0x5ac] ss:$16 sps:$4 sm:$0xff]   ;;  %v3719_v15 = vld [vmem:[#allocation5 + $0x5a0] ss:$16 sps:$4 sm:$0xff]  }
  0xc8   :  { %1406 = vmatpush1.bf16.msra.mxu0 %v3635_v16  ;;  %1570 = vmatpush1.bf16.msra.mxu1 %v3638_v17  ;;  %v3722_v16 = vld [vmem:[#allocation5 + $0x5a8] ss:$16 sps:$4 sm:$0xff]   ;;  %v3727_v17 = vld [vmem:[#allocation5 + $0x5c4] ss:$16 sps:$4 sm:$0xff]  }
  0xc9   :  { %1416 = vmatprep.subr.bf16.mxu0 %v3643_v18  ;;  %1580 = vmatprep.subr.bf16.mxu1 %v3646_v19  ;;  %v3730_v18 = vld [vmem:[#allocation5 + $0x5cc] ss:$16 sps:$4 sm:$0xff]   ;;  %v3725_v19 = vld [vmem:[#allocation5 + $0x5c0] ss:$16 sps:$4 sm:$0xff]  }
  0xcb   :  { %1408 = vmatmul.mubr.bf16.vlgmr.msra.gmra.mrb[0].mxu0 %v127_v21  ;;  %1572 = vmatmul.mubr.bf16.vlgmr.msra.gmra.mrb[0].mxu1 %v127_v21  ;;  %v3733_v21 = vld [vmem:[#allocation5 + $0x5e4] ss:$16 sps:$4 sm:$0xff]  }
  0xcc   :  { %1417 = vmatpush1.bf16.msra.mxu0 %v3641_v20  ;;  %1581 = vmatpush1.bf16.msra.mxu1 %v3644_v22  ;;  %v3728_v20 = vld [vmem:[#allocation5 + $0x5c8] ss:$16 sps:$4 sm:$0xff]   ;;  %v3736_v22 = vld [vmem:[#allocation5 + $0x5ec] ss:$16 sps:$4 sm:$0xff]  }
  0xcd   :  { %1418 = vmatprep.subr.bf16.mxu0 %v3649_v24  ;;  %1582 = vmatprep.subr.bf16.mxu1 %v3652_v25  ;;  %v3731_v24 = vld [vmem:[#allocation5 + $0x5e0] ss:$16 sps:$4 sm:$0xff]   ;;  %v3734_v25 = vld [vmem:[#allocation5 + $0x5e8] ss:$16 sps:$4 sm:$0xff]  }
  0xce   :  { %1448 = vmatprep.mubr.bf16.mxu0 %v130_v31  ;;  %1612 = vmatprep.mubr.bf16.mxu1 %v130_v31  ;;  %v3746_v31 = vld [vmem:[#allocation7 + $0x4] ss:$16 sps:$4 sm:$0xff]  }
  0xd0   :  { %1419 = vmatpush1.bf16.msra.mxu0 %v3647_v9  ;;  %1583 = vmatpush1.bf16.msra.mxu1 %v3650_v28  ;;  %v3743_v9 = vld [vmem:[#allocation5 + $0x60c] ss:$16 sps:$4 sm:$0xff]   ;;  %v3738_v28 = vld [vmem:[#allocation5 + $0x600] ss:$16 sps:$4 sm:$0xff]  }
  0xd1   :  { %1420 = vmatprep.subr.bf16.mxu0 %v3655_v29  ;;  %1584 = vmatprep.subr.bf16.mxu1 %v3658_v30  ;;  %v3741_v29 = vld [vmem:[#allocation5 + $0x608] ss:$16 sps:$4 sm:$0xff]   ;;  %v129_v30 = vpack.c.bf16 %v4208_v26, %v4208_v26 }
  0xd4   :  { %1421 = vmatpush1.bf16.msra.mxu0 %v3653_v32  ;;  %1585 = vmatpush1.bf16.msra.mxu1 %v3656_v33  ;;  %v3749_v32 = vld [vmem:[#allocation7 + $0xc] ss:$16 sps:$4 sm:$0xff]   ;;  %v102_v33 = vcombine.high %v4204_v23, %v4204_v23  ;;  %v3758_v23 = vld [vmem:[#allocation7 + $0x44] ss:$16 sps:$4 sm:$0xff]  }
  0xd5   :  { %1422 = vmatprep.subr.bf16.mxu0 %v3661_v34  ;;  %1586 = vmatprep.subr.bf16.mxu1 %v3664_v35  ;;  %v4095_v34 = vmov 0   ;;  %v3744_v35 = vld [vmem:[#allocation7] ss:$16 sps:$4 sm:$0xff]  }
  0xd6   :  { %v116_v26 = vrot.slane %v102_v33, %v4194_v49  ;;  %v3762_v49 = vld [vmem:[#allocation7 + $0x60] ss:$16 sps:$4 sm:$0xff]   ;;  %v3839_v33 = vld [vmem:[#allocation7 + $0x1ec] ss:$16 sps:$4 sm:$0xff]  }
  0xd8   :  { %1423 = vmatpush1.bf16.msra.mxu0 %v3659_v36  ;;  %1587 = vmatpush1.bf16.msra.mxu1 %v3662_v37  ;;  %v3747_v36 = vld [vmem:[#allocation7 + $0x8] ss:$16 sps:$4 sm:$0xff]   ;;  %v131_v37 = vpack.c.bf16 %v116_v26, %v116_v26 }
  0xd9   :  { %1424 = vmatprep.subr.bf16.mxu0 %v3667_v38  ;;  %1588 = vmatprep.subr.bf16.mxu1 %v3670_v39  ;;  %v3752_v38 = vld [vmem:[#allocation7 + $0x24] ss:$16 sps:$4 sm:$0xff]   ;;  %v3755_v39 = vld [vmem:[#allocation7 + $0x2c] ss:$16 sps:$4 sm:$0xff]   ;;  %v3837_v26 = vld [vmem:[#allocation7 + $0x1e8] ss:$16 sps:$4 sm:$0xff]  }
  0xdc   :  { %1425 = vmatpush1.bf16.msra.mxu0 %v3665_v40  ;;  %1589 = vmatpush1.bf16.msra.mxu1 %v3668_v41  ;;  %v3750_v40 = vld [vmem:[#allocation7 + $0x20] ss:$16 sps:$4 sm:$0xff]   ;;  %v3753_v41 = vld [vmem:[#allocation7 + $0x28] ss:$16 sps:$4 sm:$0xff]  }
  0xdd   :  { %1426 = vmatprep.subr.bf16.mxu0 %v3673_v42  ;;  %1590 = vmatprep.subr.bf16.mxu1 %v3676_v44  ;;  %v3761_v42 = vld [vmem:[#allocation7 + $0x4c] ss:$16 sps:$4 sm:$0xff]   ;;  %v3756_v44 = vld [vmem:[#allocation7 + $0x40] ss:$16 sps:$4 sm:$0xff]  }
  0xe0   :  { %1427 = vmatpush1.bf16.msra.mxu0 %v3671_v45  ;;  %1591 = vmatpush1.bf16.msra.mxu1 %v3674_v46  ;;  %v3759_v45 = vld [vmem:[#allocation7 + $0x48] ss:$16 sps:$4 sm:$0xff]   ;;  %v3764_v46 = vld [vmem:[#allocation7 + $0x64] ss:$16 sps:$4 sm:$0xff]  }
  0xe1   :  { %1428 = vmatprep.subr.bf16.mxu0 %v3679_v47  ;;  %1592 = vmatprep.subr.bf16.mxu1 %v3682_v48  ;;  %v3767_v47 = vld [vmem:[#allocation7 + $0x6c] ss:$16 sps:$4 sm:$0xff]   ;;  %v3765_v48 = vld [vmem:[#allocation7 + $0x68] ss:$16 sps:$4 sm:$0xff]  }
  0xe4   :  { %1429 = vmatpush1.bf16.msra.mxu0 %v3677_v50  ;;  %1593 = vmatpush1.bf16.msra.mxu1 %v3680_v51  ;;  %v3770_v50 = vld [vmem:[#allocation7 + $0x84] ss:$16 sps:$4 sm:$0xff]   ;;  %v3773_v51 = vld [vmem:[#allocation7 + $0x8c] ss:$16 sps:$4 sm:$0xff]  }
  0xe5   :  { %1430 = vmatprep.subr.bf16.mxu0 %v3685_v52  ;;  %1594 = vmatprep.subr.bf16.mxu1 %v3688_v53  ;;  %v3768_v52 = vld [vmem:[#allocation7 + $0x80] ss:$16 sps:$4 sm:$0xff]   ;;  %v3771_v53 = vld [vmem:[#allocation7 + $0x88] ss:$16 sps:$4 sm:$0xff]  }
  0xe8   :  { %1431 = vmatpush1.bf16.msra.mxu0 %v3683_v54  ;;  %1595 = vmatpush1.bf16.msra.mxu1 %v3686_v55  ;;  %v3776_v54 = vld [vmem:[#allocation7 + $0xa4] ss:$16 sps:$4 sm:$0xff]   ;;  %v3779_v55 = vld [vmem:[#allocation7 + $0xac] ss:$16 sps:$4 sm:$0xff]  }
  0xe9   :  { %1432 = vmatprep.subr.bf16.mxu0 %v3691_v56  ;;  %1596 = vmatprep.subr.bf16.mxu1 %v3694_v57  ;;  %v3774_v56 = vld [vmem:[#allocation7 + $0xa0] ss:$16 sps:$4 sm:$0xff]   ;;  %v3777_v57 = vld [vmem:[#allocation7 + $0xa8] ss:$16 sps:$4 sm:$0xff]  }
  0xec   :  { %1433 = vmatpush1.bf16.msra.mxu0 %v3689_v58  ;;  %1597 = vmatpush1.bf16.msra.mxu1 %v3692_v59  ;;  %v3782_v58 = vld [vmem:[#allocation7 + $0xc4] ss:$16 sps:$4 sm:$0xff]   ;;  %v3785_v59 = vld [vmem:[#allocation7 + $0xcc] ss:$16 sps:$4 sm:$0xff]  }
  0xed   :  { %1434 = vmatprep.subr.bf16.mxu0 %v3697_v60  ;;  %1598 = vmatprep.subr.bf16.mxu1 %v3700_v61  ;;  %v3780_v60 = vld [vmem:[#allocation7 + $0xc0] ss:$16 sps:$4 sm:$0xff]   ;;  %v3783_v61 = vld [vmem:[#allocation7 + $0xc8] ss:$16 sps:$4 sm:$0xff]  }
  0xf0   :  { %1435 = vmatpush1.bf16.msra.mxu0 %v3695_v62  ;;  %1599 = vmatpush1.bf16.msra.mxu1 %v3698_v63  ;;  %v3788_v62 = vld [vmem:[#allocation7 + $0xe4] ss:$16 sps:$4 sm:$0xff]   ;;  %v3791_v63 = vld [vmem:[#allocation7 + $0xec] ss:$16 sps:$4 sm:$0xff]  }
  0xf1   :  { %1436 = vmatprep.subr.bf16.mxu0 %v3703_v0  ;;  %1600 = vmatprep.subr.bf16.mxu1 %v3706_v1  ;;  %v3786_v0 = vld [vmem:[#allocation7 + $0xe0] ss:$16 sps:$4 sm:$0xff]   ;;  %v3789_v1 = vld [vmem:[#allocation7 + $0xe8] ss:$16 sps:$4 sm:$0xff]  }
  0xf4   :  { %1437 = vmatpush1.bf16.msra.mxu0 %v3701_v2  ;;  %1601 = vmatpush1.bf16.msra.mxu1 %v3704_v3  ;;  %v3794_v2 = vld [vmem:[#allocation7 + $0x104] ss:$16 sps:$4 sm:$0xff]   ;;  %v3797_v3 = vld [vmem:[#allocation7 + $0x10c] ss:$16 sps:$4 sm:$0xff]  }
  0xf5   :  { %1438 = vmatprep.subr.bf16.mxu0 %v3709_v4  ;;  %1602 = vmatprep.subr.bf16.mxu1 %v3712_v5  ;;  %v3792_v4 = vld [vmem:[#allocation7 + $0x100] ss:$16 sps:$4 sm:$0xff]   ;;  %v3795_v5 = vld [vmem:[#allocation7 + $0x108] ss:$16 sps:$4 sm:$0xff]  }
  0xf8   :  { %1439 = vmatpush1.bf16.msra.mxu0 %v3707_v6  ;;  %1603 = vmatpush1.bf16.msra.mxu1 %v3710_v7  ;;  %v3800_v6 = vld [vmem:[#allocation7 + $0x124] ss:$16 sps:$4 sm:$0xff]   ;;  %v3803_v7 = vld [vmem:[#allocation7 + $0x12c] ss:$16 sps:$4 sm:$0xff]  }
  0xf9   :  { %1440 = vmatprep.subr.bf16.mxu0 %v3715_v8  ;;  %1604 = vmatprep.subr.bf16.mxu1 %v3718_v10  ;;  %v3798_v8 = vld [vmem:[#allocation7 + $0x120] ss:$16 sps:$4 sm:$0xff]   ;;  %v3801_v10 = vld [vmem:[#allocation7 + $0x128] ss:$16 sps:$4 sm:$0xff]  }
  0xfc   :  { %1441 = vmatpush1.bf16.msra.mxu0 %v3713_v11  ;;  %1605 = vmatpush1.bf16.msra.mxu1 %v3716_v12  ;;  %v3806_v11 = vld [vmem:[#allocation7 + $0x144] ss:$16 sps:$4 sm:$0xff]   ;;  %v3809_v12 = vld [vmem:[#allocation7 + $0x14c] ss:$16 sps:$4 sm:$0xff]  }
  0xfd   :  { %1442 = vmatprep.subr.bf16.mxu0 %v3721_v13  ;;  %1606 = vmatprep.subr.bf16.mxu1 %v3724_v14  ;;  %v3804_v13 = vld [vmem:[#allocation7 + $0x140] ss:$16 sps:$4 sm:$0xff]   ;;  %v3807_v14 = vld [vmem:[#allocation7 + $0x148] ss:$16 sps:$4 sm:$0xff]  }
 0x100   :  { %1443 = vmatpush1.bf16.msra.mxu0 %v3719_v15  ;;  %1607 = vmatpush1.bf16.msra.mxu1 %v3722_v16  ;;  %v3812_v15 = vld [vmem:[#allocation7 + $0x164] ss:$16 sps:$4 sm:$0xff]   ;;  %v3815_v16 = vld [vmem:[#allocation7 + $0x16c] ss:$16 sps:$4 sm:$0xff]  }
 0x101   :  { %1444 = vmatprep.subr.bf16.mxu0 %v3727_v17  ;;  %1608 = vmatprep.subr.bf16.mxu1 %v3730_v18  ;;  %v3810_v17 = vld [vmem:[#allocation7 + $0x160] ss:$16 sps:$4 sm:$0xff]   ;;  %v3813_v18 = vld [vmem:[#allocation7 + $0x168] ss:$16 sps:$4 sm:$0xff]  }
 0x104   :  { %1445 = vmatpush1.bf16.msra.mxu0 %v3725_v19  ;;  %1609 = vmatpush1.bf16.msra.mxu1 %v3728_v20  ;;  %v3818_v19 = vld [vmem:[#allocation7 + $0x184] ss:$16 sps:$4 sm:$0xff]   ;;  %v3821_v20 = vld [vmem:[#allocation7 + $0x18c] ss:$16 sps:$4 sm:$0xff]  }
 0x105   :  { %1446 = vmatprep.subr.bf16.mxu0 %v3733_v21  ;;  %1610 = vmatprep.subr.bf16.mxu1 %v3736_v22  ;;  %v3816_v21 = vld [vmem:[#allocation7 + $0x180] ss:$16 sps:$4 sm:$0xff]   ;;  %v3819_v22 = vld [vmem:[#allocation7 + $0x188] ss:$16 sps:$4 sm:$0xff]  }
 0x108   :  { %1447 = vmatpush1.bf16.msra.mxu0 %v3731_v24  ;;  %1611 = vmatpush1.bf16.msra.mxu1 %v3734_v25  ;;  %v3824_v24 = vld [vmem:[#allocation7 + $0x1a4] ss:$16 sps:$4 sm:$0xff]   ;;  %v3827_v25 = vld [vmem:[#allocation7 + $0x1ac] ss:$16 sps:$4 sm:$0xff]  }
 0x109   :  { %1457 = vmatprep.subr.bf16.mxu0 %v3740_v27  ;;  %1621 = vmatprep.subr.bf16.mxu1 %v3743_v9  ;;  %v3822_v27 = vld [vmem:[#allocation7 + $0x1a0] ss:$16 sps:$4 sm:$0xff]   ;;  %v3825_v9 = vld [vmem:[#allocation7 + $0x1a8] ss:$16 sps:$4 sm:$0xff]  }
 0x10b   :  { %1449 = vmatmul.mubr.bf16.vlgmr.msra.gmra.mrb[0].mxu0 %v129_v30  ;;  %1613 = vmatmul.mubr.bf16.vlgmr.msra.gmra.mrb[0].mxu1 %v129_v30  ;;  %v3828_v30 = vld [vmem:[#allocation7 + $0x1c0] ss:$16 sps:$4 sm:$0xff]  }
 0x10c   :  { %1458 = vmatpush1.bf16.msra.mxu0 %v3738_v28  ;;  %1622 = vmatpush1.bf16.msra.mxu1 %v3741_v29  ;;  %v3830_v28 = vld [vmem:[#allocation7 + $0x1c4] ss:$16 sps:$4 sm:$0xff]   ;;  %v3833_v29 = vld [vmem:[#allocation7 + $0x1cc] ss:$16 sps:$4 sm:$0xff]  }
 0x10d   :  { %1489 = vmatprep.mubr.bf16.mxu0 %v4095_v34  ;;  %1653 = vmatprep.mubr.bf16.mxu1 %v4095_v34  ;;  %v3834_v34 = vld [vmem:[#allocation7 + $0x1e0] ss:$16 sps:$4 sm:$0xff]  }
 0x10e   :  { %2460 = vmatprep.subr.bf16.mxu0 %v3746_v31  ;;  %2542 = vmatprep.subr.bf16.mxu1 %v3749_v32  ;;  %v3831_v31 = vld [vmem:[#allocation7 + $0x1c8] ss:$16 sps:$4 sm:$0xff]   ;;  %v3836_v32 = vld [vmem:[#allocation7 + $0x1e4] ss:$16 sps:$4 sm:$0xff]  }
 0x117   :  { %3190 = vmatmul.mubr.msk.bf16.vlgmr.msra.gmra.mrb[0].mxu0 %vm1330_vm0, %v131_v37  ;;  %3191 = vmatmul.mubr.msk.bf16.vlgmr.msra.gmra.mrb[0].mxu1 %vm1330_vm0, %v131_v37  ;;  %v332_v37 = vsub.s32 0, %v4191_v43 }
 0x118   :  { %2461 = vmatpush1.bf16.msra.mxu0 %v3744_v35  ;;  %2543 = vmatpush1.bf16.msra.mxu1 %v3747_v36  ;;  %v3842_v35 = vld [vmem:[#allocation7 + $0x204] ss:$16 sps:$4 sm:$0xff]   ;;  %v3845_v36 = vld [vmem:[#allocation7 + $0x20c] ss:$16 sps:$4 sm:$0xff]  }
 0x119   :  { %2462 = vmatprep.subr.bf16.mxu0 %v3752_v38  ;;  %2544 = vmatprep.subr.bf16.mxu1 %v3755_v39  ;;  %v4221_v38 = vld [vmem:[%s4269_s2] sm:$0xf]  ;;  %v336_v39 = vsub.s32 1, %v4191_v43 }
 0x11c   :  { %2463 = vmatpush1.bf16.msra.mxu0 %v3750_v40  ;;  %2545 = vmatpush1.bf16.msra.mxu1 %v3753_v41  ;;  %v344_v40 = vsub.s32 3, %v4191_v43  ;;  %v333_v41 = vrot.slane %v4221_v38, %v332_v37 }
 0x11d   :  { %2464 = vmatprep.subr.bf16.mxu0 %v3758_v23  ;;  %2546 = vmatprep.subr.bf16.mxu1 %v3761_v42  ;;  %v337_v23 = vrot.slane %v4221_v38, %v336_v39 }
 0x11e   :  { %v345_v42 = vrot.slane %v4221_v38, %v344_v40 }
 0x120   :  { %2465 = vmatpush1.bf16.msra.mxu0 %v3756_v44  ;;  %2547 = vmatpush1.bf16.msra.mxu1 %v3759_v45 }
 0x121   :  { %2466 = vmatprep.subr.bf16.mxu0 %v3764_v46  ;;  %2548 = vmatprep.subr.bf16.mxu1 %v3767_v47 }
 0x124   :  { %2467 = vmatpush1.bf16.msra.mxu0 %v3762_v49  ;;  %2549 = vmatpush1.bf16.msra.mxu1 %v3765_v48 }
 0x125   :  { %2468 = vmatprep.subr.bf16.mxu0 %v3770_v50  ;;  %2550 = vmatprep.subr.bf16.mxu1 %v3773_v51 }
 0x128   :  { %2469 = vmatpush1.bf16.msra.mxu0 %v3768_v52  ;;  %2551 = vmatpush1.bf16.msra.mxu1 %v3771_v53 }
 0x129   :  { %2470 = vmatprep.subr.bf16.mxu0 %v3776_v54  ;;  %2552 = vmatprep.subr.bf16.mxu1 %v3779_v55 }
 0x12c   :  { %2471 = vmatpush1.bf16.msra.mxu0 %v3774_v56  ;;  %2553 = vmatpush1.bf16.msra.mxu1 %v3777_v57 }
 0x12d   :  { %2472 = vmatprep.subr.bf16.mxu0 %v3782_v58  ;;  %2554 = vmatprep.subr.bf16.mxu1 %v3785_v59  ;;  %v3840_v59 = vld [vmem:[#allocation7 + $0x200] ss:$16 sps:$4 sm:$0xff]  }
 0x130   :  { %2473 = vmatpush1.bf16.msra.mxu0 %v3780_v60  ;;  %2555 = vmatpush1.bf16.msra.mxu1 %v3783_v61  ;;  %v3843_v60 = vld [vmem:[#allocation7 + $0x208] ss:$16 sps:$4 sm:$0xff]  }
 0x131   :  { %2474 = vmatprep.subr.bf16.mxu0 %v3788_v62  ;;  %2556 = vmatprep.subr.bf16.mxu1 %v3791_v63  ;;  %v3848_v62 = vld [vmem:[#allocation7 + $0x224] ss:$16 sps:$4 sm:$0xff]   ;;  %v3851_v63 = vld [vmem:[#allocation7 + $0x22c] ss:$16 sps:$4 sm:$0xff]  }
 0x134   :  { %2475 = vmatpush1.bf16.msra.mxu0 %v3786_v0  ;;  %2557 = vmatpush1.bf16.msra.mxu1 %v3789_v1  ;;  %v3846_v1 = vld [vmem:[#allocation7 + $0x220] ss:$16 sps:$4 sm:$0xff]  }
 0x135   :  { %2476 = vmatprep.subr.bf16.mxu0 %v3794_v2  ;;  %2558 = vmatprep.subr.bf16.mxu1 %v3797_v3  ;;  %v3849_v2 = vld [vmem:[#allocation7 + $0x228] ss:$16 sps:$4 sm:$0xff]   ;;  %v3854_v3 = vld [vmem:[#allocation7 + $0x244] ss:$16 sps:$4 sm:$0xff]  }
 0x138   :  { %2477 = vmatpush1.bf16.msra.mxu0 %v3792_v4  ;;  %2559 = vmatpush1.bf16.msra.mxu1 %v3795_v5  ;;  %v3857_v4 = vld [vmem:[#allocation7 + $0x24c] ss:$16 sps:$4 sm:$0xff]   ;;  %v3852_v5 = vld [vmem:[#allocation7 + $0x240] ss:$16 sps:$4 sm:$0xff]  }
 0x139   :  { %2478 = vmatprep.subr.bf16.mxu0 %v3800_v6  ;;  %2560 = vmatprep.subr.bf16.mxu1 %v3803_v7  ;;  %v3855_v6 = vld [vmem:[#allocation7 + $0x248] ss:$16 sps:$4 sm:$0xff]   ;;  %v3860_v7 = vld [vmem:[#allocation7 + $0x264] ss:$16 sps:$4 sm:$0xff]  }
 0x13c   :  { %2479 = vmatpush1.bf16.msra.mxu0 %v3798_v8  ;;  %2561 = vmatpush1.bf16.msra.mxu1 %v3801_v10  ;;  %v3863_v8 = vld [vmem:[#allocation7 + $0x26c] ss:$16 sps:$4 sm:$0xff]   ;;  %v3858_v10 = vld [vmem:[#allocation7 + $0x260] ss:$16 sps:$4 sm:$0xff]  }
 0x13d   :  { %2480 = vmatprep.subr.bf16.mxu0 %v3806_v11  ;;  %2562 = vmatprep.subr.bf16.mxu1 %v3809_v12  ;;  %v3861_v11 = vld [vmem:[#allocation7 + $0x268] ss:$16 sps:$4 sm:$0xff]   ;;  %v3866_v12 = vld [vmem:[#allocation7 + $0x284] ss:$16 sps:$4 sm:$0xff]  }
 0x140   :  { %2481 = vmatpush1.bf16.msra.mxu0 %v3804_v13  ;;  %2563 = vmatpush1.bf16.msra.mxu1 %v3807_v14  ;;  %v3869_v13 = vld [vmem:[#allocation7 + $0x28c] ss:$16 sps:$4 sm:$0xff]   ;;  %v3864_v14 = vld [vmem:[#allocation7 + $0x280] ss:$16 sps:$4 sm:$0xff]  }
 0x141   :  { %2482 = vmatprep.subr.bf16.mxu0 %v3812_v15  ;;  %2564 = vmatprep.subr.bf16.mxu1 %v3815_v16  ;;  %v3867_v15 = vld [vmem:[#allocation7 + $0x288] ss:$16 sps:$4 sm:$0xff]   ;;  %v3872_v16 = vld [vmem:[#allocation7 + $0x2a4] ss:$16 sps:$4 sm:$0xff]  }
 0x144   :  { %2483 = vmatpush1.bf16.msra.mxu0 %v3810_v17  ;;  %2565 = vmatpush1.bf16.msra.mxu1 %v3813_v18  ;;  %v3875_v17 = vld [vmem:[#allocation7 + $0x2ac] ss:$16 sps:$4 sm:$0xff]   ;;  %v3870_v18 = vld [vmem:[#allocation7 + $0x2a0] ss:$16 sps:$4 sm:$0xff]  }
 0x145   :  { %2484 = vmatprep.subr.bf16.mxu0 %v3818_v19  ;;  %2566 = vmatprep.subr.bf16.mxu1 %v3821_v20  ;;  %v3873_v19 = vld [vmem:[#allocation7 + $0x2a8] ss:$16 sps:$4 sm:$0xff]   ;;  %v3878_v20 = vld [vmem:[#allocation7 + $0x2c4] ss:$16 sps:$4 sm:$0xff]  }
 0x148   :  { %2485 = vmatpush1.bf16.msra.mxu0 %v3816_v21  ;;  %2567 = vmatpush1.bf16.msra.mxu1 %v3819_v22  ;;  %v3881_v21 = vld [vmem:[#allocation7 + $0x2cc] ss:$16 sps:$4 sm:$0xff]   ;;  %v3876_v22 = vld [vmem:[#allocation7 + $0x2c0] ss:$16 sps:$4 sm:$0xff]  }
 0x149   :  { %2486 = vmatprep.subr.bf16.mxu0 %v3824_v24  ;;  %2568 = vmatprep.subr.bf16.mxu1 %v3827_v25  ;;  %v3879_v24 = vld [vmem:[#allocation7 + $0x2c8] ss:$16 sps:$4 sm:$0xff]   ;;  %v3884_v25 = vld [vmem:[#allocation7 + $0x2e4] ss:$16 sps:$4 sm:$0xff]  }
 0x14c   :  { %2487 = vmatpush1.bf16.msra.mxu0 %v3822_v27  ;;  %2569 = vmatpush1.bf16.msra.mxu1 %v3825_v9  ;;  %v3887_v27 = vld [vmem:[#allocation7 + $0x2ec] ss:$16 sps:$4 sm:$0xff]   ;;  %v3882_v9 = vld [vmem:[#allocation7 + $0x2e0] ss:$16 sps:$4 sm:$0xff]  }
 0x14d   :  { %2488 = vmatprep.subr.bf16.mxu0 %v3830_v28  ;;  %2570 = vmatprep.subr.bf16.mxu1 %v3833_v29  ;;  %v3885_v28 = vld [vmem:[#allocation7 + $0x2e8] ss:$16 sps:$4 sm:$0xff]   ;;  %v3890_v29 = vld [vmem:[#allocation7 + $0x304] ss:$16 sps:$4 sm:$0xff]  }
 0x150   :  { %2489 = vmatpush1.bf16.msra.mxu0 %v3828_v30  ;;  %2571 = vmatpush1.bf16.msra.mxu1 %v3831_v31  ;;  %v3893_v30 = vld [vmem:[#allocation7 + $0x30c] ss:$16 sps:$4 sm:$0xff]   ;;  %v3888_v31 = vld [vmem:[#allocation7 + $0x300] ss:$16 sps:$4 sm:$0xff]  }
 0x151   :  { %2490 = vmatprep.subr.bf16.mxu0 %v3836_v32  ;;  %2572 = vmatprep.subr.bf16.mxu1 %v3839_v33  ;;  %v3891_v32 = vld [vmem:[#allocation7 + $0x308] ss:$16 sps:$4 sm:$0xff]   ;;  %v3896_v33 = vld [vmem:[#allocation7 + $0x324] ss:$16 sps:$4 sm:$0xff]  }
 0x154   :  { %2491 = vmatpush1.bf16.msra.mxu0 %v3834_v34  ;;  %2573 = vmatpush1.bf16.msra.mxu1 %v3837_v26  ;;  %v3899_v34 = vld [vmem:[#allocation7 + $0x32c] ss:$16 sps:$4 sm:$0xff]   ;;  %v3894_v26 = vld [vmem:[#allocation7 + $0x320] ss:$16 sps:$4 sm:$0xff]  }
 0x155   :  { %2501 = vmatprep.subr.bf16.mxu0 %v3842_v35  ;;  %2583 = vmatprep.subr.bf16.mxu1 %v3845_v36  ;;  %v3897_v35 = vld [vmem:[#allocation7 + $0x328] ss:$16 sps:$4 sm:$0xff]   ;;  %v3902_v36 = vld [vmem:[#allocation7 + $0x344] ss:$16 sps:$4 sm:$0xff]  }
 0x1ea   :  { %v1491_v44 = vpop.f32.mrb[0].mxu0  ;;  %v4234_v45 = vpop.f32.mrb[0].mxu1 }
 0x1eb   :  { %v3397_v46 = vadd.f32 %v1491_v44, %v333_v41  ;;  %v1493_v47 = vpop.f32.mrb[1].mxu0  ;;  %v1657_v49 = vpop.f32.mrb[1].mxu1  ;;  %v3905_v41 = vld [vmem:[#allocation7 + $0x34c] ss:$16 sps:$4 sm:$0xff]   ;;  %v3908_v44 = vld [vmem:[#allocation7 + $0x364] ss:$16 sps:$4 sm:$0xff]  }
 0x1ec   :  { %v3398_v48 = vadd.f32 %v1493_v47, %v337_v23  ;;  %v3400_v50 = vadd.f32 %v1657_v49, %v345_v42  ;;  %v1495_v51 = vpop.f32.mrb[2].mxu0  ;;  %v1659_v52 = vpop.f32.mrb[2].mxu1  ;;  %v3900_v23 = vld [vmem:[#allocation7 + $0x340] ss:$16 sps:$4 sm:$0xff]   ;;  %v3903_v42 = vld [vmem:[#allocation7 + $0x348] ss:$16 sps:$4 sm:$0xff]  }
 0x1ed   :  { %v1662_v53 = vmax.f32 %v3397_v46, 0.0  ;;  %v1496_v54 = vpop.f32.mrb[3].mxu0  ;;  %v1660_v55 = vpop.f32.mrb[3].mxu1  ;;  %v3911_v46 = vld [vmem:[#allocation7 + $0x36c] ss:$16 sps:$4 sm:$0xff]  }
 0x1ee   :  { %v1663_v56 = vmax.f32 %v3398_v48, 0.0  ;;  %v1665_v57 = vmax.f32 %v3400_v50, 0.0  ;;  %v3906_v47 = vld [vmem:[#allocation7 + $0x360] ss:$16 sps:$4 sm:$0xff]   ;;  %v3909_v49 = vld [vmem:[#allocation7 + $0x368] ss:$16 sps:$4 sm:$0xff]  }
 0x1ef   :  { %v1666_v61 = vpack.c.bf16 %v1662_v53, %v1662_v53  ;;  %v3914_v48 = vld [vmem:[#allocation7 + $0x384] ss:$16 sps:$4 sm:$0xff]   ;;  %v3917_v50 = vld [vmem:[#allocation7 + $0x38c] ss:$16 sps:$4 sm:$0xff]   ;;  %v3912_v51 = vld [vmem:[#allocation7 + $0x380] ss:$16 sps:$4 sm:$0xff]  }
 0x1f0   :  { %v1667_v58 = vpack.c.bf16 %v1663_v56, %v1663_v56  ;;  %v1669_v0 = vpack.c.bf16 %v1665_v57, %v1665_v57  ;;  %v3915_v52 = vld [vmem:[#allocation7 + $0x388] ss:$16 sps:$4 sm:$0xff]   ;;  %v340_v53 = vsub.s32 2, %v4191_v43  ;;  %v3920_v54 = vld [vmem:[#allocation7 + $0x3a4] ss:$16 sps:$4 sm:$0xff]  }
 0x1f1   :  { %v3923_v55 = vld [vmem:[#allocation7 + $0x3ac] ss:$16 sps:$4 sm:$0xff]   ;;  %v3918_v56 = vld [vmem:[#allocation7 + $0x3a0] ss:$16 sps:$4 sm:$0xff]   ;;  %v3921_v57 = vld [vmem:[#allocation7 + $0x3a8] ss:$16 sps:$4 sm:$0xff]  }
 0x1f2   :  { %2492 = vmatprep.mubr.bf16.mxu0 %v1667_v58  ;;  %2574 = vmatprep.mubr.bf16.mxu1 %v1667_v58  ;;  %v341_v58 = vrot.slane %v4221_v38, %v340_v53  ;;  %v3936_v38 = vld [vmem:[#allocation8 + $0x40] sm:$0xff]  }
 0x1f3   :  { %2493 = vmatmul.mubr.bf16.vlgmr.msra.gmra.mrb[4].mxu0 %v1666_v61  ;;  %2575 = vmatmul.mubr.bf16.vlgmr.msra.gmra.mrb[4].mxu1 %v1666_v61  ;;  %v3924_v61 = vld [vmem:[#allocation7 + $0x3c0] ss:$16 sps:$4 sm:$0xff]  }
 0x1f4   :  { %2502 = vmatpush1.bf16.msra.mxu0 %v3840_v59  ;;  %2584 = vmatpush1.bf16.msra.mxu1 %v3843_v60  ;;  %v3926_v59 = vld [vmem:[#allocation7 + $0x3c4] ss:$16 sps:$4 sm:$0xff]   ;;  %v3929_v60 = vld [vmem:[#allocation7 + $0x3cc] ss:$16 sps:$4 sm:$0xff]  }
 0x1f5   :  { %2533 = vmatprep.mubr.bf16.mxu0 %v1669_v0  ;;  %2615 = vmatprep.mubr.bf16.mxu1 %v1669_v0  ;;  %v3932_v0 = vld [vmem:[#allocation7 + $0x3e4] ss:$16 sps:$4 sm:$0xff]  }
 0x1f6   :  { %2503 = vmatprep.subr.bf16.mxu0 %v3848_v62  ;;  %2585 = vmatprep.subr.bf16.mxu1 %v3851_v63  ;;  %v3927_v62 = vld [vmem:[#allocation7 + $0x3c8] ss:$16 sps:$4 sm:$0xff]   ;;  %v3399_v63 = vadd.f32 %v4234_v45, %v341_v58 }
 0x1f7   :  { %v3940_v45 = vld [vmem:[#allocation8 + $0x48] sm:$0xff]  }
 0x1f8   :  { %2504 = vmatpush1.bf16.msra.mxu0 %v3846_v1  ;;  %2586 = vmatpush1.bf16.msra.mxu1 %v3849_v2  ;;  %v3935_v1 = vld [vmem:[#allocation7 + $0x3ec] ss:$16 sps:$4 sm:$0xff]   ;;  %v3930_v2 = vld [vmem:[#allocation7 + $0x3e0] ss:$16 sps:$4 sm:$0xff]  }
 0x1f9   :  { %2505 = vmatprep.subr.bf16.mxu0 %v3854_v3  ;;  %2587 = vmatprep.subr.bf16.mxu1 %v3857_v4  ;;  %v3933_v3 = vld [vmem:[#allocation7 + $0x3e8] ss:$16 sps:$4 sm:$0xff]   ;;  %v1664_v4 = vmax.f32 %v3399_v63, 0.0 }
 0x1fc   :  { %2506 = vmatpush1.bf16.msra.mxu0 %v3852_v5  ;;  %2588 = vmatpush1.bf16.msra.mxu1 %v3855_v6  ;;  %v3937_v5 = vld [vmem:[#allocation8 + $0xc0] sm:$0xff]  }
 0x1fd   :  { %2507 = vmatprep.subr.bf16.mxu0 %v3860_v7  ;;  %2589 = vmatprep.subr.bf16.mxu1 %v3863_v8  ;;  %v3938_v6 = vld [vmem:[#allocation8] sm:$0xff]   ;;  %v1668_v8 = vpack.c.bf16 %v1664_v4, %v1664_v4 }
 0x1fe   :  { %v3939_v7 = vld [vmem:[#allocation8 + $0x80] sm:$0xff]  }
 0x200   :  { %2508 = vmatpush1.bf16.msra.mxu0 %v3858_v10  ;;  %2590 = vmatpush1.bf16.msra.mxu1 %v3861_v11  ;;  %v3941_v10 = vld [vmem:[#allocation8 + $0xc8] sm:$0xff]  }
 0x201   :  { %2509 = vmatprep.subr.bf16.mxu0 %v3866_v12  ;;  %2591 = vmatprep.subr.bf16.mxu1 %v3869_v13  ;;  %v3942_v11 = vld [vmem:[#allocation8 + $0x8] sm:$0xff]   ;;  %v3944_v13 = vld [vmem:[#allocation8 + $0x50] sm:$0xff]  }
 0x202   :  { %v3943_v12 = vld [vmem:[#allocation8 + $0x88] sm:$0xff]  }
 0x204   :  { %2510 = vmatpush1.bf16.msra.mxu0 %v3864_v14  ;;  %2592 = vmatpush1.bf16.msra.mxu1 %v3867_v15  ;;  %v3945_v14 = vld [vmem:[#allocation8 + $0xd0] sm:$0xff]  }
 0x205   :  { %2511 = vmatprep.subr.bf16.mxu0 %v3872_v16  ;;  %2593 = vmatprep.subr.bf16.mxu1 %v3875_v17  ;;  %v3946_v15 = vld [vmem:[#allocation8 + $0x10] sm:$0xff]   ;;  %v3948_v17 = vld [vmem:[#allocation8 + $0x58] sm:$0xff]  }
 0x206   :  { %v3947_v16 = vld [vmem:[#allocation8 + $0x90] sm:$0xff]  }
 0x208   :  { %2512 = vmatpush1.bf16.msra.mxu0 %v3870_v18  ;;  %2594 = vmatpush1.bf16.msra.mxu1 %v3873_v19  ;;  %v3949_v18 = vld [vmem:[#allocation8 + $0xd8] sm:$0xff]  }
 0x209   :  { %2513 = vmatprep.subr.bf16.mxu0 %v3878_v20  ;;  %2595 = vmatprep.subr.bf16.mxu1 %v3881_v21  ;;  %v3950_v19 = vld [vmem:[#allocation8 + $0x18] sm:$0xff]   ;;  %v3952_v21 = vld [vmem:[#allocation8 + $0x60] sm:$0xff]  }
 0x20a   :  { %v3951_v20 = vld [vmem:[#allocation8 + $0x98] sm:$0xff]  }
 0x20c   :  { %2514 = vmatpush1.bf16.msra.mxu0 %v3876_v22  ;;  %2596 = vmatpush1.bf16.msra.mxu1 %v3879_v24  ;;  %v3953_v22 = vld [vmem:[#allocation8 + $0xe0] sm:$0xff]  }
 0x20d   :  { %2515 = vmatprep.subr.bf16.mxu0 %v3884_v25  ;;  %2597 = vmatprep.subr.bf16.mxu1 %v3887_v27  ;;  %v3954_v24 = vld [vmem:[#allocation8 + $0x20] sm:$0xff]   ;;  %v3956_v27 = vld [vmem:[#allocation8 + $0x68] sm:$0xff]  }
 0x20e   :  { %v3955_v25 = vld [vmem:[#allocation8 + $0xa0] sm:$0xff]  }
 0x210   :  { %2516 = vmatpush1.bf16.msra.mxu0 %v3882_v9  ;;  %2598 = vmatpush1.bf16.msra.mxu1 %v3885_v28  ;;  %v3957_v9 = vld [vmem:[#allocation8 + $0xe8] sm:$0xff]  }
 0x211   :  { %2517 = vmatprep.subr.bf16.mxu0 %v3890_v29  ;;  %2599 = vmatprep.subr.bf16.mxu1 %v3893_v30  ;;  %v3958_v28 = vld [vmem:[#allocation8 + $0x28] sm:$0xff]   ;;  %v3960_v30 = vld [vmem:[#allocation8 + $0x70] sm:$0xff]  }
 0x212   :  { %v3959_v29 = vld [vmem:[#allocation8 + $0xa8] sm:$0xff]  }
 0x214   :  { %2518 = vmatpush1.bf16.msra.mxu0 %v3888_v31  ;;  %2600 = vmatpush1.bf16.msra.mxu1 %v3891_v32  ;;  %v3961_v31 = vld [vmem:[#allocation8 + $0xf0] sm:$0xff]  }
 0x215   :  { %2519 = vmatprep.subr.bf16.mxu0 %v3896_v33  ;;  %2601 = vmatprep.subr.bf16.mxu1 %v3899_v34  ;;  %v3962_v32 = vld [vmem:[#allocation8 + $0x30] sm:$0xff]   ;;  %v3964_v34 = vld [vmem:[#allocation8 + $0x78] sm:$0xff]  }
 0x216   :  { %v3963_v33 = vld [vmem:[#allocation8 + $0xb0] sm:$0xff]  }
 0x218   :  { %2520 = vmatpush1.bf16.msra.mxu0 %v3894_v26  ;;  %2602 = vmatpush1.bf16.msra.mxu1 %v3897_v35  ;;  %v3965_v26 = vld [vmem:[#allocation8 + $0xf8] sm:$0xff]  }
 0x219   :  { %2521 = vmatprep.subr.bf16.mxu0 %v3902_v36  ;;  %2603 = vmatprep.subr.bf16.mxu1 %v3905_v41  ;;  %v3966_v35 = vld [vmem:[#allocation8 + $0x38] sm:$0xff]   ;;  %v1798_v41 = vld [vmem:[%s4271_s4] sm:$0xf] }
 0x21a   :  { %v3967_v36 = vld [vmem:[#allocation8 + $0xb8] sm:$0xff]  }
 0x21c   :  { %2522 = vmatpush1.bf16.msra.mxu0 %v3900_v23  ;;  %2604 = vmatpush1.bf16.msra.mxu1 %v3903_v42  ;;  %v1803_v23 = vrot.slane %v1798_v41, %v332_v37  ;;  %v1811_v42 = vrot.slane %v1798_v41, %v340_v53 }
 0x21d   :  { %2523 = vmatprep.subr.bf16.mxu0 %v3908_v44  ;;  %2605 = vmatprep.subr.bf16.mxu1 %v3911_v46  ;;  %v1807_v44 = vrot.slane %v1798_v41, %v336_v39  ;;  %v1815_v46 = vrot.slane %v1798_v41, %v344_v40 }
 0x220   :  { %2524 = vmatpush1.bf16.msra.mxu0 %v3906_v47  ;;  %2606 = vmatpush1.bf16.msra.mxu1 %v3909_v49 }
 0x221   :  { %2525 = vmatprep.subr.bf16.mxu0 %v3914_v48  ;;  %2607 = vmatprep.subr.bf16.mxu1 %v3917_v50 }
 0x224   :  { %2526 = vmatpush1.bf16.msra.mxu0 %v3912_v51  ;;  %2608 = vmatpush1.bf16.msra.mxu1 %v3915_v52 }
 0x225   :  { %2527 = vmatprep.subr.bf16.mxu0 %v3920_v54  ;;  %2609 = vmatprep.subr.bf16.mxu1 %v3923_v55 }
 0x228   :  { %2528 = vmatpush1.bf16.msra.mxu0 %v3918_v56  ;;  %2610 = vmatpush1.bf16.msra.mxu1 %v3921_v57 }
 0x229   :  { %2529 = vmatprep.subr.bf16.mxu0 %v3926_v59  ;;  %2611 = vmatprep.subr.bf16.mxu1 %v3929_v60 }
 0x22c   :  { %2530 = vmatpush1.bf16.msra.mxu0 %v3924_v61  ;;  %2612 = vmatpush1.bf16.msra.mxu1 %v3927_v62 }
 0x22d   :  { %2531 = vmatprep.subr.bf16.mxu0 %v3932_v0  ;;  %2613 = vmatprep.subr.bf16.mxu1 %v3935_v1  ;;  %v3320_v1 = vld [vmem:[%s4273_s6] ss:$0 sm:$0xff] }
 0x230   :  { %2532 = vmatpush1.bf16.msra.mxu0 %v3930_v2  ;;  %2614 = vmatpush1.bf16.msra.mxu1 %v3933_v3 }
 0x231   :  { %3353 = vmatprep.subr.bf16.mxu0 %v3936_v38  ;;  %3375 = vmatprep.subr.bf16.mxu1 %v3937_v5 }
 0x233   :  { %2534 = vmatmul.mubr.bf16.vlgmr.msra.gmra.mrb[4].mxu0 %v1668_v8  ;;  %2616 = vmatmul.mubr.bf16.vlgmr.msra.gmra.mrb[4].mxu1 %v1668_v8 }
 0x234   :  { %3354 = vmatpush3.bf16.msra.mxu0 %v3938_v6  ;;  %3376 = vmatpush3.bf16.msra.mxu1 %v3939_v7 }
 0x235   :  { %3355 = vmatprep.subr.bf16.mxu0 %v3940_v45  ;;  %3377 = vmatprep.subr.bf16.mxu1 %v3941_v10 }
 0x238   :  { %3356 = vmatpush3.bf16.msra.mxu0 %v3942_v11  ;;  %3378 = vmatpush3.bf16.msra.mxu1 %v3943_v12 }
 0x239   :  { %3357 = vmatprep.subr.bf16.mxu0 %v3944_v13  ;;  %3379 = vmatprep.subr.bf16.mxu1 %v3945_v14 }
 0x23c   :  { %3358 = vmatpush3.bf16.msra.mxu0 %v3946_v15  ;;  %3380 = vmatpush3.bf16.msra.mxu1 %v3947_v16 }
 0x23d   :  { %3359 = vmatprep.subr.bf16.mxu0 %v3948_v17  ;;  %3381 = vmatprep.subr.bf16.mxu1 %v3949_v18 }
 0x240   :  { %3360 = vmatpush3.bf16.msra.mxu0 %v3950_v19  ;;  %3382 = vmatpush3.bf16.msra.mxu1 %v3951_v20 }
 0x241   :  { %3361 = vmatprep.subr.bf16.mxu0 %v3952_v21  ;;  %3383 = vmatprep.subr.bf16.mxu1 %v3953_v22 }
 0x244   :  { %3362 = vmatpush3.bf16.msra.mxu0 %v3954_v24  ;;  %3384 = vmatpush3.bf16.msra.mxu1 %v3955_v25 }
 0x245   :  { %3363 = vmatprep.subr.bf16.mxu0 %v3956_v27  ;;  %3385 = vmatprep.subr.bf16.mxu1 %v3957_v9 }
 0x248   :  { %3364 = vmatpush3.bf16.msra.mxu0 %v3958_v28  ;;  %3386 = vmatpush3.bf16.msra.mxu1 %v3959_v29 }
 0x249   :  { %3365 = vmatprep.subr.bf16.mxu0 %v3960_v30  ;;  %3387 = vmatprep.subr.bf16.mxu1 %v3961_v31 }
 0x24c   :  { %3366 = vmatpush3.bf16.msra.mxu0 %v3962_v32  ;;  %3388 = vmatpush3.bf16.msra.mxu1 %v3963_v33 }
 0x24d   :  { %3367 = vmatprep.subr.bf16.mxu0 %v3964_v34  ;;  %3389 = vmatprep.subr.bf16.mxu1 %v3965_v26 }
 0x250   :  { %3368 = vmatpush3.bf16.msra.mxu0 %v3966_v35  ;;  %3390 = vmatpush3.bf16.msra.mxu1 %v3967_v36 }
 0x306   :  { %v2535_v47 = vpop.f32.mrb[4].mxu0  ;;  %v2617_v49 = vpop.f32.mrb[4].mxu1 }
 0x307   :  { %v3401_v48 = vadd.f32 %v2535_v47, %v1803_v23  ;;  %v3403_v50 = vadd.f32 %v2617_v49, %v1811_v42  ;;  %v2537_v51 = vpop.f32.mrb[5].mxu0  ;;  %v2619_v52 = vpop.f32.mrb[5].mxu1 }
 0x308   :  { %v3402_v54 = vadd.f32 %v2537_v51, %v1807_v44  ;;  %v3404_v55 = vadd.f32 %v2619_v52, %v1815_v46  ;;  %v2539_v56 = vpop.f32.mrb[6].mxu0  ;;  %v2621_v57 = vpop.f32.mrb[6].mxu1 }
 0x309   :  { %v2624_v37 = vmax.f32 %v3401_v48, 0.0  ;;  %v2626_v58 = vmax.f32 %v3403_v50, 0.0  ;;  %v2540_v59 = vpop.f32.mrb[7].mxu0  ;;  %v2622_v53 = vpop.f32.mrb[7].mxu1 }
 0x30a   :  { %v2625_v60 = vmax.f32 %v3402_v54, 0.0  ;;  %v2627_v61 = vmax.f32 %v3404_v55, 0.0 }
 0x30b   :  { %v2628_v43 = vpack.c.bf16 %v2624_v37, %v2624_v37  ;;  %v2630_v40 = vpack.c.bf16 %v2626_v58, %v2626_v58 }
 0x30c   :  { %v2629_v39 = vpack.c.bf16 %v2625_v60, %v2625_v60  ;;  %v2631_v62 = vpack.c.bf16 %v2627_v61, %v2627_v61 }
 0x30e   :  { %2927 = vmatprep.mubr.bf16.mxu0 %v2629_v39  ;;  %2967 = vmatprep.mubr.bf16.mxu1 %v2631_v62 }
 0x30f   :  { %2928 = vmatmul.mubr.bf16.vlgmr.msra.gmra.mrb[8].mxu0 %v2628_v43  ;;  %2968 = vmatmul.mubr.bf16.vlgmr.msra.gmra.mrb[8].mxu1 %v2630_v40 }
 0x3e2   :  { %v3369_v63 = vpop.f32.mrb[8].mxu0  ;;  %v3391_v0 = vpop.f32.mrb[8].mxu1 }
 0x3e3   :  { %v3370_v2 = vpop.f32.mrb[9].mxu0  ;;  %v3392_v3 = vpop.f32.mrb[9].mxu1 }
 0x3e4   :  { %v3371_v4 = vadd.f32 %v3370_v2, %v3369_v63  ;;  %v3393_v38 = vadd.f32 %v3392_v3, %v3391_v0  ;;  %v3372_v5 = vpop.f32.mrb[10].mxu0  ;;  %v3394_v6 = vpop.f32.mrb[10].mxu1 }
 0x3e5   :  { %v3373_v7 = vpop.f32.mrb[11].mxu0  ;;  %v3395_v8 = vpop.f32.mrb[11].mxu1 }
 0x3e6   :  { %v2930_v45 = vadd.f32 %v3371_v4, %v3320_v1 }
 0x3e8   :  { %v2970_v10 = vadd.f32 %v3393_v38, %v2930_v45 }
 0x3ea   :  { %v2975_v11 = vpack.c.bf16 %v2970_v10, %v2970_v10 }
 0x3ec   :  { %2976 = vst [vmem:[#allocation10] sm:$0x1] %v2975_v11 }
 0x3ed   :  { %4067 = shalt.err (!%p4064_p8)
}
 0x3ee   :  { %s4068_s13 = scalar_lea.hbm %s4274_s7, 16 }
 0x3ef   :  { %p4069_p9 = scmp.ne.s32.totalorder %s4274_s7, %s4068_s13  ;;  %p4072_p10 = scmp.lt.u32.totalorder %s4068_s13, %s4274_s7 }
 0x3f1   :  { %p4074_p11 = pnand %p4072_p10, %p4069_p9 }
 0x3f3   :  { %4077 = shalt.err (!%p4074_p11)
}
 0x3f4   :  { %2986 = dma.vmem_to_hbm [thread:$0]  %s2984_s30, 16, %s4274_s7, [#allocation4]  }
 0x3f5   :  { %4084 = dma.done.wait [#allocation4], 16  }
 0x3f6   :  { %4085 = vsyncadd [#allocation4], 4294967280 }
 0x3f7   :  { %2990 = vsyncpa [#allocation3], 1 }
 0x3f8   :  { %2991 = vsyncpa [#allocation6], 1 }
 0x3f9   :  { %2992 = vsyncpa [#allocation9], 1 }
 0x3fa   :  { %2993 = vsyncpa [#allocation4], 1 }

</bundles_post_ra>
